<compile_context>
chip_gen: v7x
topology: tpu7x:2x2x1
jax: 0.10.0
libtpu: 0.0.40
codegen_flags: <defaults>
</compile_context>

<pallas_src>
import jax
import jax.numpy as jnp
from jax.experimental import pallas as pl
from jax.experimental.pallas import tpu as pltpu

EPS = 1e-5
CHANNELS = [3, 32, 64, 128, 64, 32, 1]  # ic/oc chain of the 6 MLP layers


def mlps_kernel(x_ref,
                w1, b1, w2, b2, w3, b3, w4, b4, w5, b5, w6,
                o_ref):
    """One (3, tm) column-tile of points through the full 6-layer MLP stack."""
    x = x_ref[...]                      # (3, tm) f32, points on the lane axis
    w1f = w1[...]                       # (32, 3) f32, BN scale pre-folded

    # Layer 1: K = 3 contraction -> 3 VPU broadcast FMAs (skip the MXU).
    h = (w1f[:, 0:1] * x[0:1, :]
         + w1f[:, 1:2] * x[1:2, :]
         + w1f[:, 2:3] * x[2:3, :])     # (32, tm) f32
    h = jnp.maximum(h + b1[...], 0.0)

    def layer(h, w_ref, b_ref):
        # bf16 MXU matmul with f32 accumulation; BN already folded into w/bias.
        y = jnp.dot(w_ref[...], h.astype(jnp.bfloat16),
                    preferred_element_type=jnp.float32)
        return jnp.maximum(y + b_ref[...], 0.0)

    h = layer(h, w2, b2)                # (64,  tm)
    h = layer(h, w3, b3)                # (128, tm)
    h = layer(h, w4, b4)                # (64,  tm)
    h = layer(h, w5, b5)                # (32,  tm)

    # Layer 6: plain linear, oc = 1 -> lane-dense (1, tm) output row.
    o_ref[...] = jnp.dot(w6[...], h.astype(jnp.bfloat16),
                         preferred_element_type=jnp.float32)


def init_raw_params(key):
    """Deterministic synthetic parameters matching MLPs.__init__ shapes.

    Conv2d(ic, oc, 1, bias=False) weight is kept as (oc, ic); BN layers carry
    gamma/beta/running_mean/running_var (eval-mode semantics).
    """
    params = []
    keys = jax.random.split(key, 6)
    for li in range(6):
        ic, oc = CHANNELS[li], CHANNELS[li + 1]
        kw, kg, kb, km, kv = jax.random.split(keys[li], 5)
        p = {"w": jax.random.normal(kw, (oc, ic), jnp.float32)
                  * (1.0 / jnp.sqrt(jnp.float32(ic)))}
        if li < 5:  # layers 1..5 have BatchNorm
            p["gamma"] = 1.0 + 0.1 * jax.random.normal(kg, (oc,), jnp.float32)
            p["beta"] = 0.1 * jax.random.normal(kb, (oc,), jnp.float32)
            p["mean"] = 0.05 * jax.random.normal(km, (oc,), jnp.float32)
            p["var"] = 1.0 + 0.1 * jax.random.uniform(kv, (oc,), jnp.float32)
        params.append(p)
    return params


def fold_params(raw_params):
    """Fold BN scale into weights; emit kernel-ready (W', bias) arrays."""
    flat = []
    for li in range(6):
        p = raw_params[li]
        w = p["w"]                                        # (oc, ic)
        if li < 5:
            scale = p["gamma"] / jnp.sqrt(p["var"] + EPS)  # (oc,)
            bias = (p["beta"] - p["mean"] * scale).reshape(-1, 1)
            wf = w * scale[:, None]
            if li == 0:
                flat.append(wf.astype(jnp.float32))        # VPU path stays f32
            else:
                flat.append(wf.astype(jnp.bfloat16))       # MXU path in bf16
            flat.append(bias.astype(jnp.float32))
        else:
            flat.append(w.astype(jnp.bfloat16))            # final linear, no BN
    return flat


def mlps_forward(lines, raw_params, tm=512):
    """lines: (B, N, 3) float32  ->  sdf: (B, N) float32."""
    B, N, C = lines.shape
    assert C == 3
    M = B * N
    assert tm % 128 == 0, "row tile must be lane-aligned (multiple of 128)"
    assert M % tm == 0, "B*N must be a multiple of the row tile"

    # Points on the lane axis: (3, M) input, (1, M) output (lane-dense stores).
    x_t = lines.reshape(M, C).astype(jnp.float32).T

    flat = fold_params(raw_params)

    in_specs = [pl.BlockSpec((C, tm), lambda i: (0, i))]
    for p in flat:
        in_specs.append(pl.BlockSpec(p.shape, lambda i: (0, 0)))

    flops = 2 * M * sum(CHANNELS[l] * CHANNELS[l + 1] for l in range(6))
    bytes_accessed = (M * C * 4 + M * 4
                      + sum(int(p.size) * p.dtype.itemsize for p in flat))

    out = pl.pallas_call(
        mlps_kernel,
        out_shape=jax.ShapeDtypeStruct((1, M), jnp.float32),
        grid_spec=pltpu.PrefetchScalarGridSpec(
            num_scalar_prefetch=0,
            grid=(M // tm,),
            in_specs=in_specs,
            out_specs=pl.BlockSpec((1, tm), lambda i: (0, i)),
        ),
        compiler_params=pltpu.CompilerParams(
            dimension_semantics=("parallel",),
            vmem_limit_bytes=32 * 1024 * 1024),
        cost_estimate=pl.CostEstimate(
            flops=flops, transcendentals=0, bytes_accessed=bytes_accessed),
    )(x_t, *flat)

    return out.reshape(B, N)


def mlps_reference(lines, raw_params):
    """Pure-JAX f32 reference (eval-mode BN) for correctness check."""
    B, N, C = lines.shape
    h = lines.reshape(B * N, C).astype(jnp.float32)
    for li in range(6):
        p = raw_params[li]
        h = h @ p["w"].T
        if li < 5:
            scale = p["gamma"] / jnp.sqrt(p["var"] + EPS)
            h = h * scale + (p["beta"] - p["mean"] * scale)
            h = jnp.maximum(h, 0.0)
    return h.reshape(B, N)


if __name__ == "__main__":
    key = jax.random.PRNGKey(0)
    kx, kp = jax.random.split(key)

    # lines: (batch, num_points, 3); M = 2048 -> grid of 4 tiles of 512 points.
    B, N = 2, 1024
    lines = jax.random.normal(kx, (B, N, 3), jnp.float32)
    raw_params = init_raw_params(kp)

    sdf = jax.block_until_ready(mlps_forward(lines, raw_params, tm=512))
    ref = mlps_reference(lines, raw_params)

    assert sdf.shape == (B, N)
    max_err = float(jnp.max(jnp.abs(sdf - ref)))
    # bf16 MXU inputs (f32 accumulation) -> relaxed tolerance vs the f32 reference.
    assert jnp.allclose(sdf, ref, atol=5e-2, rtol=5e-2), \
        f"mismatch vs reference, max|err|={max_err}"

    print("KERNEL_OK")
</pallas_src>

<mosaic_0001>
module attributes {stable_mosaic.version = 11 : i64} {
  func.func @mlps_kernel(%arg0: i32, %arg1: memref<3x512xf32, #tpu.memory_space<vmem>>, %arg2: memref<32x3xf32, #tpu.memory_space<vmem>>, %arg3: memref<32x1xf32, #tpu.memory_space<vmem>>, %arg4: memref<64x32xbf16, #tpu.memory_space<vmem>>, %arg5: memref<64x1xf32, #tpu.memory_space<vmem>>, %arg6: memref<128x64xbf16, #tpu.memory_space<vmem>>, %arg7: memref<128x1xf32, #tpu.memory_space<vmem>>, %arg8: memref<64x128xbf16, #tpu.memory_space<vmem>>, %arg9: memref<64x1xf32, #tpu.memory_space<vmem>>, %arg10: memref<32x64xbf16, #tpu.memory_space<vmem>>, %arg11: memref<32x1xf32, #tpu.memory_space<vmem>>, %arg12: memref<1x32xbf16, #tpu.memory_space<vmem>>, %arg13: memref<1x512xf32, #tpu.memory_space<vmem>>) attributes {dimension_semantics = [#tpu.dimension_semantics<parallel>], iteration_bounds = array<i64: 4>, scalar_prefetch = 0 : i64, scratch_operands = 0 : i64, tpu.core_type = #tpu.core_type<tc>, window_params = [{transform_indices = @transform_0, window_bounds = array<i64: 3, 512>}, {pipeline_mode = #tpu.pipeline_mode<synchronous>, transform_indices = @transform_1, window_bounds = array<i64: 32, 3>}, {pipeline_mode = #tpu.pipeline_mode<synchronous>, transform_indices = @transform_2, window_bounds = array<i64: 32, 1>}, {pipeline_mode = #tpu.pipeline_mode<synchronous>, transform_indices = @transform_3, window_bounds = array<i64: 64, 32>}, {pipeline_mode = #tpu.pipeline_mode<synchronous>, transform_indices = @transform_4, window_bounds = array<i64: 64, 1>}, {pipeline_mode = #tpu.pipeline_mode<synchronous>, transform_indices = @transform_5, window_bounds = array<i64: 128, 64>}, {pipeline_mode = #tpu.pipeline_mode<synchronous>, transform_indices = @transform_6, window_bounds = array<i64: 128, 1>}, {pipeline_mode = #tpu.pipeline_mode<synchronous>, transform_indices = @transform_7, window_bounds = array<i64: 64, 128>}, {pipeline_mode = #tpu.pipeline_mode<synchronous>, transform_indices = @transform_8, window_bounds = array<i64: 64, 1>}, {pipeline_mode = #tpu.pipeline_mode<synchronous>, transform_indices = @transform_9, window_bounds = array<i64: 32, 64>}, {pipeline_mode = #tpu.pipeline_mode<synchronous>, transform_indices = @transform_10, window_bounds = array<i64: 32, 1>}, {pipeline_mode = #tpu.pipeline_mode<synchronous>, transform_indices = @transform_11, window_bounds = array<i64: 1, 32>}, {transform_indices = @transform_12, window_bounds = array<i64: 1, 512>}]} {
    %c0 = arith.constant 0 : index
    %c0_0 = arith.constant 0 : index
    %0 = vector.load %arg1[%c0, %c0_0] : memref<3x512xf32, #tpu.memory_space<vmem>>, vector<3x512xf32>
    %c0_1 = arith.constant 0 : index
    %c0_2 = arith.constant 0 : index
    %1 = vector.load %arg2[%c0_1, %c0_2] : memref<32x3xf32, #tpu.memory_space<vmem>>, vector<32x3xf32>
    %2 = vector.extract_strided_slice %1 {offsets = [0, 0], sizes = [32, 1], strides = [1, 1]} : vector<32x3xf32> to vector<32x1xf32>
    %3 = vector.extract_strided_slice %0 {offsets = [0, 0], sizes = [1, 512], strides = [1, 1]} : vector<3x512xf32> to vector<1x512xf32>
    %4 = vector.broadcast %2 : vector<32x1xf32> to vector<32x512xf32>
    %5 = vector.broadcast %3 : vector<1x512xf32> to vector<32x512xf32>
    %6 = arith.mulf %4, %5 : vector<32x512xf32>
    %7 = vector.extract_strided_slice %1 {offsets = [0, 1], sizes = [32, 1], strides = [1, 1]} : vector<32x3xf32> to vector<32x1xf32>
    %8 = vector.extract_strided_slice %0 {offsets = [1, 0], sizes = [1, 512], strides = [1, 1]} : vector<3x512xf32> to vector<1x512xf32>
    %9 = vector.broadcast %7 : vector<32x1xf32> to vector<32x512xf32>
    %10 = vector.broadcast %8 : vector<1x512xf32> to vector<32x512xf32>
    %11 = arith.mulf %9, %10 : vector<32x512xf32>
    %12 = arith.addf %6, %11 : vector<32x512xf32>
    %13 = vector.extract_strided_slice %1 {offsets = [0, 2], sizes = [32, 1], strides = [1, 1]} : vector<32x3xf32> to vector<32x1xf32>
    %14 = vector.extract_strided_slice %0 {offsets = [2, 0], sizes = [1, 512], strides = [1, 1]} : vector<3x512xf32> to vector<1x512xf32>
    %15 = vector.broadcast %13 : vector<32x1xf32> to vector<32x512xf32>
    %16 = vector.broadcast %14 : vector<1x512xf32> to vector<32x512xf32>
    %17 = arith.mulf %15, %16 : vector<32x512xf32>
    %18 = arith.addf %12, %17 : vector<32x512xf32>
    %c0_3 = arith.constant 0 : index
    %c0_4 = arith.constant 0 : index
    %19 = vector.load %arg3[%c0_3, %c0_4] : memref<32x1xf32, #tpu.memory_space<vmem>>, vector<32x1xf32>
    %20 = vector.broadcast %19 : vector<32x1xf32> to vector<32x512xf32>
    %21 = arith.addf %18, %20 : vector<32x512xf32>
    %cst = arith.constant 0.000000e+00 : f32
    %22 = vector.broadcast %cst : f32 to vector<32x512xf32>
    %23 = arith.maximumf %21, %22 : vector<32x512xf32>
    %c0_5 = arith.constant 0 : index
    %c0_6 = arith.constant 0 : index
    %24 = vector.load %arg4[%c0_5, %c0_6] : memref<64x32xbf16, #tpu.memory_space<vmem>>, vector<64x32xbf16>
    %25 = arith.truncf %23 : vector<32x512xf32> to vector<32x512xbf16>
    %cst_7 = arith.constant dense<0.000000e+00> : vector<64x512xf32>
    %26 = tpu.matmul %24, %25, %cst_7 {dimension_numbers = #tpu.dot_dimension_numbers<[1], [0], [0], [1], [0, 0, 1, 1], [], []>} : vector<64x32xbf16>, vector<32x512xbf16>, vector<64x512xf32> -> vector<64x512xf32>
    %c0_8 = arith.constant 0 : index
    %c0_9 = arith.constant 0 : index
    %27 = vector.load %arg5[%c0_8, %c0_9] : memref<64x1xf32, #tpu.memory_space<vmem>>, vector<64x1xf32>
    %28 = vector.broadcast %27 : vector<64x1xf32> to vector<64x512xf32>
    %29 = arith.addf %26, %28 : vector<64x512xf32>
    %cst_10 = arith.constant 0.000000e+00 : f32
    %30 = vector.broadcast %cst_10 : f32 to vector<64x512xf32>
    %31 = arith.maximumf %29, %30 : vector<64x512xf32>
    %c0_11 = arith.constant 0 : index
    %c0_12 = arith.constant 0 : index
    %32 = vector.load %arg6[%c0_11, %c0_12] : memref<128x64xbf16, #tpu.memory_space<vmem>>, vector<128x64xbf16>
    %33 = arith.truncf %31 : vector<64x512xf32> to vector<64x512xbf16>
    %cst_13 = arith.constant dense<0.000000e+00> : vector<128x512xf32>
    %34 = tpu.matmul %32, %33, %cst_13 {dimension_numbers = #tpu.dot_dimension_numbers<[1], [0], [0], [1], [0, 0, 1, 1], [], []>} : vector<128x64xbf16>, vector<64x512xbf16>, vector<128x512xf32> -> vector<128x512xf32>
    %c0_14 = arith.constant 0 : index
    %c0_15 = arith.constant 0 : index
    %35 = vector.load %arg7[%c0_14, %c0_15] : memref<128x1xf32, #tpu.memory_space<vmem>>, vector<128x1xf32>
    %36 = vector.broadcast %35 : vector<128x1xf32> to vector<128x512xf32>
    %37 = arith.addf %34, %36 : vector<128x512xf32>
    %cst_16 = arith.constant 0.000000e+00 : f32
    %38 = vector.broadcast %cst_16 : f32 to vector<128x512xf32>
    %39 = arith.maximumf %37, %38 : vector<128x512xf32>
    %c0_17 = arith.constant 0 : index
    %c0_18 = arith.constant 0 : index
    %40 = vector.load %arg8[%c0_17, %c0_18] : memref<64x128xbf16, #tpu.memory_space<vmem>>, vector<64x128xbf16>
    %41 = arith.truncf %39 : vector<128x512xf32> to vector<128x512xbf16>
    %cst_19 = arith.constant dense<0.000000e+00> : vector<64x512xf32>
    %42 = tpu.matmul %40, %41, %cst_19 {dimension_numbers = #tpu.dot_dimension_numbers<[1], [0], [0], [1], [0, 0, 1, 1], [], []>} : vector<64x128xbf16>, vector<128x512xbf16>, vector<64x512xf32> -> vector<64x512xf32>
    %c0_20 = arith.constant 0 : index
    %c0_21 = arith.constant 0 : index
    %43 = vector.load %arg9[%c0_20, %c0_21] : memref<64x1xf32, #tpu.memory_space<vmem>>, vector<64x1xf32>
    %44 = vector.broadcast %43 : vector<64x1xf32> to vector<64x512xf32>
    %45 = arith.addf %42, %44 : vector<64x512xf32>
    %cst_22 = arith.constant 0.000000e+00 : f32
    %46 = vector.broadcast %cst_22 : f32 to vector<64x512xf32>
    %47 = arith.maximumf %45, %46 : vector<64x512xf32>
    %c0_23 = arith.constant 0 : index
    %c0_24 = arith.constant 0 : index
    %48 = vector.load %arg10[%c0_23, %c0_24] : memref<32x64xbf16, #tpu.memory_space<vmem>>, vector<32x64xbf16>
    %49 = arith.truncf %47 : vector<64x512xf32> to vector<64x512xbf16>
    %cst_25 = arith.constant dense<0.000000e+00> : vector<32x512xf32>
    %50 = tpu.matmul %48, %49, %cst_25 {dimension_numbers = #tpu.dot_dimension_numbers<[1], [0], [0], [1], [0, 0, 1, 1], [], []>} : vector<32x64xbf16>, vector<64x512xbf16>, vector<32x512xf32> -> vector<32x512xf32>
    %c0_26 = arith.constant 0 : index
    %c0_27 = arith.constant 0 : index
    %51 = vector.load %arg11[%c0_26, %c0_27] : memref<32x1xf32, #tpu.memory_space<vmem>>, vector<32x1xf32>
    %52 = vector.broadcast %51 : vector<32x1xf32> to vector<32x512xf32>
    %53 = arith.addf %50, %52 : vector<32x512xf32>
    %cst_28 = arith.constant 0.000000e+00 : f32
    %54 = vector.broadcast %cst_28 : f32 to vector<32x512xf32>
    %55 = arith.maximumf %53, %54 : vector<32x512xf32>
    %c0_29 = arith.constant 0 : index
    %c0_30 = arith.constant 0 : index
    %56 = vector.load %arg12[%c0_29, %c0_30] : memref<1x32xbf16, #tpu.memory_space<vmem>>, vector<1x32xbf16>
    %57 = arith.truncf %55 : vector<32x512xf32> to vector<32x512xbf16>
    %cst_31 = arith.constant dense<0.000000e+00> : vector<1x512xf32>
    %58 = tpu.matmul %56, %57, %cst_31 {dimension_numbers = #tpu.dot_dimension_numbers<[1], [0], [0], [1], [0, 0, 1, 1], [], []>} : vector<1x32xbf16>, vector<32x512xbf16>, vector<1x512xf32> -> vector<1x512xf32>
    %c0_32 = arith.constant 0 : index
    %c0_33 = arith.constant 0 : index
    %59 = vector.load %arg13[%c0_32, %c0_33] : memref<1x512xf32, #tpu.memory_space<vmem>>, vector<1x512xf32>
    tpu.vector_store %arg13[%c0_32, %c0_33], %58 {strides = array<i32>} : memref<1x512xf32, #tpu.memory_space<vmem>>, vector<1x512xf32>,
    return
  }
  func.func @transform_0(%arg0: i32) -> (i32, i32) {
    %c0_i32 = arith.constant 0 : i32
    %c0_i32_0 = arith.constant 0 : i32
    return %c0_i32, %arg0 : i32, i32
  }
  func.func @transform_1(%arg0: i32) -> (i32, i32) {
    %c0_i32 = arith.constant 0 : i32
    %c0_i32_0 = arith.constant 0 : i32
    %c0_i32_1 = arith.constant 0 : i32
    return %c0_i32, %c0_i32_0 : i32, i32
  }
  func.func @transform_2(%arg0: i32) -> (i32, i32) {
    %c0_i32 = arith.constant 0 : i32
    %c0_i32_0 = arith.constant 0 : i32
    %c0_i32_1 = arith.constant 0 : i32
    return %c0_i32, %c0_i32_0 : i32, i32
  }
  func.func @transform_3(%arg0: i32) -> (i32, i32) {
    %c0_i32 = arith.constant 0 : i32
    %c0_i32_0 = arith.constant 0 : i32
    %c0_i32_1 = arith.constant 0 : i32
    return %c0_i32, %c0_i32_0 : i32, i32
  }
  func.func @transform_4(%arg0: i32) -> (i32, i32) {
    %c0_i32 = arith.constant 0 : i32
    %c0_i32_0 = arith.constant 0 : i32
    %c0_i32_1 = arith.constant 0 : i32
    return %c0_i32, %c0_i32_0 : i32, i32
  }
  func.func @transform_5(%arg0: i32) -> (i32, i32) {
    %c0_i32 = arith.constant 0 : i32
    %c0_i32_0 = arith.constant 0 : i32
    %c0_i32_1 = arith.constant 0 : i32
    return %c0_i32, %c0_i32_0 : i32, i32
  }
  func.func @transform_6(%arg0: i32) -> (i32, i32) {
    %c0_i32 = arith.constant 0 : i32
    %c0_i32_0 = arith.constant 0 : i32
    %c0_i32_1 = arith.constant 0 : i32
    return %c0_i32, %c0_i32_0 : i32, i32
  }
  func.func @transform_7(%arg0: i32) -> (i32, i32) {
    %c0_i32 = arith.constant 0 : i32
    %c0_i32_0 = arith.constant 0 : i32
    %c0_i32_1 = arith.constant 0 : i32
    return %c0_i32, %c0_i32_0 : i32, i32
  }
  func.func @transform_8(%arg0: i32) -> (i32, i32) {
    %c0_i32 = arith.constant 0 : i32
    %c0_i32_0 = arith.constant 0 : i32
    %c0_i32_1 = arith.constant 0 : i32
    return %c0_i32, %c0_i32_0 : i32, i32
  }
  func.func @transform_9(%arg0: i32) -> (i32, i32) {
    %c0_i32 = arith.constant 0 : i32
    %c0_i32_0 = arith.constant 0 : i32
    %c0_i32_1 = arith.constant 0 : i32
    return %c0_i32, %c0_i32_0 : i32, i32
  }
  func.func @transform_10(%arg0: i32) -> (i32, i32) {
    %c0_i32 = arith.constant 0 : i32
    %c0_i32_0 = arith.constant 0 : i32
    %c0_i32_1 = arith.constant 0 : i32
    return %c0_i32, %c0_i32_0 : i32, i32
  }
  func.func @transform_11(%arg0: i32) -> (i32, i32) {
    %c0_i32 = arith.constant 0 : i32
    %c0_i32_0 = arith.constant 0 : i32
    %c0_i32_1 = arith.constant 0 : i32
    return %c0_i32, %c0_i32_0 : i32, i32
  }
  func.func @transform_12(%arg0: i32) -> (i32, i32) {
    %c0_i32 = arith.constant 0 : i32
    %c0_i32_0 = arith.constant 0 : i32
    return %c0_i32, %arg0 : i32, i32
  }
}

</mosaic_0001>

<bundles_post_ra>
// kernel: tpu_custom_call.1
= control target key start
LH: loop header
LB: loop body
LE: loop exit
PB: predicated region body
PF: predicated region fallthrough
CT: control target
= control target key end

     0   :  { %s2840_s0 = inlined_call_operand.vmem [shape: f32[3,2048], index: 0, kind: input, shape index: {}]   ;;  %s2841_s1 = inlined_call_operand.vmem [shape: f32[32,3], index: 1, kind: input, shape index: {}]   ;;  %s2842_s2 = inlined_call_operand.vmem [shape: f32[32,1], index: 2, kind: input, shape index: {}]   ;;  %s2843_s3 = inlined_call_operand.vmem [shape: bf16[64,32], index: 3, kind: input, shape index: {}]   ;;  %s2844_s4 = inlined_call_operand.vmem [shape: f32[64,1], index: 4, kind: input, shape index: {}]   ;;  %s2845_s5 = inlined_call_operand.vmem [shape: bf16[128,64], index: 5, kind: input, shape index: {}]   ;;  %s2846_s6 = inlined_call_operand.vmem [shape: f32[128,1], index: 6, kind: input, shape index: {}]   ;;  %s2847_s7 = inlined_call_operand.vmem [shape: bf16[64,128], index: 7, kind: input, shape index: {}]   ;;  %s2848_s8 = inlined_call_operand.vmem [shape: f32[64,1], index: 8, kind: input, shape index: {}]   ;;  %s2849_s9 = inlined_call_operand.vmem [shape: bf16[32,64], index: 9, kind: input, shape index: {}]   ;;  %s2850_s10 = inlined_call_operand.vmem [shape: f32[32,1], index: 10, kind: input, shape index: {}]   ;;  %s2851_s11 = inlined_call_operand.vmem [shape: bf16[1,32], index: 11, kind: input, shape index: {}]   ;;  %s2852_s12 = inlined_call_operand.hbm [shape: f32[1,2048], index: 12, kind: output, shape index: {}]  }
   0x1   :  { %2853 = sst [smem:[#allocation5_spill]] %s2840_s0 }
   0x2   :  { %2854 = sst [smem:[#allocation6_spill]] %s2841_s1 }
   0x3   :  { %17 = vsyncpa [#allocation3], 0 }
   0x4   :  { %19 = vsyncpa [#allocation3 + $0x1], 0  ;;  %s2416_s21 = smov 0   ;;  %s2418_s22 = smov 0  }
   0x5   :  { %s2420_s23 = smov 0   ;;  %s2422_s24 = smov 0  }
   0x6 LB: > { %s2437_s25 = sadd.s32 4294967295, %s2344_s24   ;;  %s2152_s26 = sadd.s32 4294967294, %s2344_s24   ;;  %s2344_s24 = sphi %s2422_s24, %s2862_s24   ;;  %s2340_s23 = sphi %s2420_s23, %s2861_s23   ;;  %s2336_s22 = sphi %s2418_s22, %s2860_s22   ;;  %s2332_s21 = sphi %s2416_s21, %s2859_s21  }
   0x7   : > { %s2441_s27 = sadd.s32 1, %s2344_s24   ;;  %s289_s28 = sadd.s32 1, %s2340_s23 }
   0x8   : > { %s286_s29 = ssub.s32 %s2344_s24, %s2441_s27  ;;  %p299_p0 = scmp.ne.s32.totalorder %s2340_s23, %s2336_s22 }
   0x9   : > { %p287_p1 = scmp.eq.s32.totalorder %s286_s29, 0  ;;  %p300_p2 = scmp.eq.s32.totalorder %s2437_s25, 3 }
   0xa   : > { %p305_p3 = scmp.ne.s32.totalorder %s2336_s22, %s2332_s21  ;;  %p306_p4 = scmp.eq.s32.totalorder %s2152_s26, 3 }
   0xb   : > { %s2452_s30 = scalar_select %p287_p1, %s2340_s23, %s289_s28  }
   0xc   : > { %p2454_p5 = por %p300_p2, %p299_p0  ;;  %p2458_p6 = por %p306_p4, %p305_p3 }
   0xd   : > { %p2155_p7 = scmp.ge.s32.totalorder %s2344_s24, 1  ;;  %p366_p8 = scmp.lt.s32.totalorder %s2344_s24, 5 }
   0xf   : > { %p367_p9 = pnand %p2155_p7, %p366_p8 }
  0x10   : > { %s2857_s1 = sld [smem:[#allocation6_spill]] (!%p367_p9)  ;;  %v2346_v1 = vmov (!%p367_p9), 2   ;;  %v2347_v2 = vmov (!%p367_p9), 1   ;;  %v2348_v5 = vmov (!%p367_p9), 0   ;;  %v665_v7 = vld [vmem:[%s2842_s2 + $0x8] sm:$0xff] (!%p367_p9)  ;;  %v736_v8 = vld [vmem:[%s2844_s4] sm:$0xff] (!%p367_p9)  ;;  %v444_v47 = vlaneseq (!%p367_p9) }
  0x11   : > { %370 = sbr.rel (%p367_p9) target bundleno = 1449 (0x5a9), region = 68  ;;  %2257 = vset.pattern.permute.xlu0 (!%p367_p9), %v2346_v1  ;;  %2256 = vset.pattern.permute.xlu1 (!%p367_p9), %v2347_v2  ;;  %v738_v9 = vld [vmem:[%s2844_s4 + $0x10] sm:$0xff] (!%p367_p9)  ;;  %v740_v10 = vld [vmem:[%s2844_s4 + $0x20] sm:$0xff] (!%p367_p9)  ;;  %v667_v15 = vld [vmem:[%s2842_s2 + $0x18] sm:$0xff] (!%p367_p9)  ;;  %s2157_s15 = sshll.u32 (!%p367_p9), %s2437_s25, 2  ;;  %vm804_vm0 = vcmask (!%p367_p9), 261120  }
  0x12   : > { %849 = vmatprep.mubr.bf16.mxu0 (!%p367_p9), %v2348_v5  ;;  %922 = vmatprep.mubr.bf16.mxu1 (!%p367_p9), %v2348_v5  ;;  %v664_v11 = vld [vmem:[%s2842_s2] sm:$0xff] (!%p367_p9)  ;;  %v742_v12 = vld [vmem:[%s2844_s4 + $0x30] sm:$0xff] (!%p367_p9)  ;;  %v737_v17 = vld [vmem:[%s2844_s4 + $0x8] sm:$0xff] (!%p367_p9)  ;;  %p409_p10 = scmp.lt.s32.totalorder (!%p367_p9), %s2157_s15, 15  ;;  %v2603_v48 = vshrl.u32 (!%p367_p9), %v444_v47, 7  ;;  %s2858_s0 = sld [smem:[#allocation5_spill]] (!%p367_p9) }
  0x13   : > { %v666_v13 = vld [vmem:[%s2842_s2 + $0x10] sm:$0xff] (!%p367_p9)  ;;  %v1027_v14 = vld [vmem:[%s2846_s6] sm:$0xff] (!%p367_p9)  ;;  %v739_v19 = vld [vmem:[%s2844_s4 + $0x18] sm:$0xff] (!%p367_p9)  ;;  %vm1163_vm1 = vcmask (!%p367_p9), 523264   ;;  %s405_s18 = sand.u32 (!%p367_p9), 1, %s2336_s22   ;;  %s2212_s20 = sshll.u32 (!%p367_p9), %s2437_s25, 6 }
  0x14   : > { %v1029_v16 = vld [vmem:[%s2846_s6 + $0x10] sm:$0xff] (!%p367_p9)  ;;  %v1031_v18 = vld [vmem:[%s2846_s6 + $0x20] sm:$0xff] (!%p367_p9)  ;;  %v741_v21 = vld [vmem:[%s2844_s4 + $0x28] sm:$0xff] (!%p367_p9)  ;;  %v514_v51 = vsub.s32 (!%p367_p9), 1, %v2603_v48  ;;  %v518_v52 = vsub.s32 (!%p367_p9), 5, %v2603_v48  ;;  %v598_v57 = vsub.s32 (!%p367_p9), 2, %v2603_v48 }
  0x15   : > { %v1033_v20 = vld [vmem:[%s2846_s6 + $0x30] sm:$0xff] (!%p367_p9)  ;;  %v1035_v22 = vld [vmem:[%s2846_s6 + $0x40] sm:$0xff] (!%p367_p9)  ;;  %v743_v23 = vld [vmem:[%s2844_s4 + $0x38] sm:$0xff] (!%p367_p9)  ;;  %v602_v58 = vsub.s32 (!%p367_p9), 6, %v2603_v48  ;;  %v446_v59 = vsub.s32 (!%p367_p9), 0, %v2603_v48  ;;  %v450_v60 = vsub.s32 (!%p367_p9), 4, %v2603_v48 }
  0x16   : > { %v418_v0 = vld [vmem:[%s2857_s1] sm:$0xff] (!%p367_p9)  ;;  %v420_v3 = vld [vmem:[%s2857_s1 + $0x10] sm:$0xff] (!%p367_p9)  ;;  %v419_v4 = vld [vmem:[%s2857_s1 + $0x8] sm:$0xff] (!%p367_p9)  ;;  %vm2075_vm2 = vcmp.lt.s32.totalorder (!%p367_p9), %v444_v47, 512  ;;  %s2350_s25 = smov (!%p367_p9), [#allocation2]  }
  0x17   : > { %581 = vperm.xlu0 (!%p367_p9), %2257, %v418_v0   ;;  %497 = vperm.xlu1 (!%p367_p9), %2256, %v418_v0   ;;  %v421_v6 = vld [vmem:[%s2857_s1 + $0x18] sm:$0xff] (!%p367_p9)  ;;  %v1037_v24 = vld [vmem:[%s2846_s6 + $0x50] sm:$0xff] (!%p367_p9)  ;;  %v1028_v25 = vld [vmem:[%s2846_s6 + $0x8] sm:$0xff] (!%p367_p9) }
  0x18   : > { %v1039_v26 = vld [vmem:[%s2846_s6 + $0x60] sm:$0xff]  ;;  %v1030_v27 = vld [vmem:[%s2846_s6 + $0x18] sm:$0xff]  ;;  %v1041_v28 = vld [vmem:[%s2846_s6 + $0x70] sm:$0xff]  ;;  %s2864_s15 = smov (!%p409_p10, %s2157_s15), 15 }
  0x19   : > { %v1032_v29 = vld [vmem:[%s2846_s6 + $0x28] sm:$0xff]  ;;  %v1518_v30 = vld [vmem:[%s2848_s8] sm:$0xff]  ;;  %v1034_v31 = vld [vmem:[%s2846_s6 + $0x38] sm:$0xff]  ;;  %s2158_s16 = sshll.u32 %s2864_s15, 2  ;;  %s2798_s15 = scalar_lea.hbm %s2852_s12, %s2212_s20 }
  0x1a   : > { %v1520_v32 = vld [vmem:[%s2848_s8 + $0x10] sm:$0xff]  ;;  %v1036_v33 = vld [vmem:[%s2846_s6 + $0x48] sm:$0xff]  ;;  %v1522_v34 = vld [vmem:[%s2848_s8 + $0x20] sm:$0xff]  ;;  %s412_s19 = scalar_lea.vmem %s2858_s0, %s2158_s16  ;;  %s2079_s16 = scalar_lea.sflag [#allocation3], %s405_s18 }
  0x1b   : > { %589 = vperm.xlu0 %2257, %v420_v3   ;;  %501 = vperm.xlu1 %2256, %v419_v4   ;;  %v1038_v35 = vld [vmem:[%s2846_s6 + $0x58] sm:$0xff]  ;;  %v1524_v36 = vld [vmem:[%s2848_s8 + $0x30] sm:$0xff]  ;;  %v1040_v37 = vld [vmem:[%s2846_s6 + $0x68] sm:$0xff] }
  0x1c   : > { %v1788_v38 = vld [vmem:[%s2850_s10] sm:$0xff]  ;;  %v1042_v39 = vld [vmem:[%s2846_s6 + $0x78] sm:$0xff]  ;;  %v1790_v40 = vld [vmem:[%s2850_s10 + $0x10] sm:$0xff] }
  0x1d   : > { %v1519_v41 = vld [vmem:[%s2848_s8 + $0x8] sm:$0xff]  ;;  %v1521_v42 = vld [vmem:[%s2848_s8 + $0x18] sm:$0xff]  ;;  %v416_v53 = vld [vmem:[%s412_s19] sm:$0x77] }
  0x1e   : > { %v1523_v43 = vld [vmem:[%s2848_s8 + $0x28] sm:$0xff]  ;;  %v1525_v44 = vld [vmem:[%s2848_s8 + $0x38] sm:$0xff]  ;;  %v515_v61 = vrot.slane %v416_v53, %v514_v51  ;;  %v519_v62 = vrot.slane %v416_v53, %v518_v52 }
  0x1f   : > { %2261 = vset.pattern.permute.xlu0 %v2348_v5  ;;  %2258 = vset.pattern.permute.xlu1 %v2346_v1  ;;  %v1789_v45 = vld [vmem:[%s2850_s10 + $0x8] sm:$0xff]  ;;  %v1791_v46 = vld [vmem:[%s2850_s10 + $0x18] sm:$0xff] }
  0x20   : > { %424 = vperm.xlu0 %2261, %v418_v0   ;;  %585 = vperm.xlu1 %2258, %v419_v4   ;;  %v417_v54 = vld [vmem:[%s412_s19 + $0x8] sm:$0x77]  ;;  %s2156_s19 = sshll.u32 %s405_s18, 2 }
  0x21   : > { %v523_v63 = vrot.slane %v417_v54, %v514_v51  ;;  %v527_v0 = vrot.slane %v417_v54, %v518_v52  ;;  %s407_s26 = scalar_lea.vmem [#allocation2], %s2156_s19  ;;  %s2286_s19 = sshll.u32 %s2350_s25, 4  ;;  %s2287_s19 = int_to_ptr.vmem [resolvable:$false] %s2286_s19 }
  0x22   : > { %s2093_s28 = sshll.u32 %s407_s26, 4  ;;  %s2288_s0 = scalar_lea.vmem %s2287_s19, 128  ;;  %s2800_s28 = int_to_ptr.vmem [resolvable:$true] %s2093_s28 }
  0x23   : > { %s2282_s17 = scalar_lea.vmem %s2800_s28, 64  ;;  %p2289_p0 = scmp.lt.s32.totalorder %s2800_s28, %s2287_s19 }
  0x24   : > { %429 = vperm.xlu0 %2261, %v419_v4   ;;  %2259 = vset.pattern.permute.xlu1 %v2348_v5  ;;  %v611_v4 = vrot.slane %v417_v54, %v602_v58  ;;  %p2283_p11 = scmp.ne.s32.totalorder %s2800_s28, %s2282_s17  ;;  %p2290_p1 = scmp.lt.s32.totalorder %s2288_s0, %s2282_s17 }
  0x25   : > { %434 = vperm.xlu1 %2259, %v420_v3  }
  0x26   : > { %p2284_p12 = pnand %p2283_p11, %p2454_p5  ;;  %p2291_p2 = por %p2290_p1, %p2289_p0 }
  0x28   : > { %439 = vperm.xlu0 %2261, %v421_v6   ;;  %p2285_p13 = pneg %p2284_p12 }
  0x29   : > { %2260 = vset.pattern.permute.xlu1 %v2347_v2  ;;  %v603_v2 = vrot.slane %v416_v53, %v602_v58 }
  0x2a   : > { %505 = vperm.xlu1 %2260, %v420_v3   ;;  %v607_v3 = vrot.slane %v417_v54, %v598_v57  ;;  %p2292_p3 = pnand %p2291_p2, %p2285_p13 }
  0x2c   : > { %675 = vperm.xlu0 %2261, %v665_v7  }
  0x2e   : > { %509 = vperm.xlu1 %2260, %v421_v6  }
  0x30   : > { %746 = vperm.xlu0 %2261, %v736_v8   ;;  %v447_v8 = vrot.slane %v416_v53, %v446_v59 }
  0x32   : > { %2262 = vset.pattern.permute.xlu1 %v2346_v1  ;;  %v599_v1 = vrot.slane %v416_v53, %v598_v57 }
  0x33   : > { %593 = vperm.xlu1 %2262, %v421_v6  }
  0x34   : > { %756 = vperm.xlu0 %2261, %v738_v9   ;;  %v451_v9 = vrot.slane %v416_v53, %v450_v60 }
  0x37   : > { %2263 = vset.pattern.permute.xlu1 %v2348_v5 }
  0x38   : > { %766 = vperm.xlu0 %2261, %v740_v10   ;;  %670 = vperm.xlu1 %2263, %v664_v11   ;;  %v455_v10 = vrot.slane %v417_v54, %v446_v59  ;;  %v459_v11 = vrot.slane %v417_v54, %v450_v60 }
  0x3c   : > { %776 = vperm.xlu0 %2261, %v742_v12   ;;  %680 = vperm.xlu1 %2263, %v666_v13   ;;  %v2614_v12 = vrot.slane %v515_v61, %v514_v51  ;;  %v2616_v13 = vrot.slane %v519_v62, %v514_v51 }
  0x40   : > { %1045 = vperm.xlu0 %2261, %v1027_v14   ;;  %685 = vperm.xlu1 %2263, %v667_v15   ;;  %v2618_v14 = vrot.slane %v523_v63, %v514_v51  ;;  %v2620_v15 = vrot.slane %v527_v0, %v514_v51 }
  0x44   : > { %1055 = vperm.xlu0 %2261, %v1029_v16   ;;  %751 = vperm.xlu1 %2263, %v737_v17   ;;  %v2622_v16 = vrot.slane %v599_v1, %v598_v57  ;;  %v2624_v17 = vrot.slane %v603_v2, %v598_v57 }
  0x48   : > { %1065 = vperm.xlu0 %2261, %v1031_v18   ;;  %761 = vperm.xlu1 %2263, %v739_v19   ;;  %v2626_v18 = vrot.slane %v607_v3, %v598_v57  ;;  %v2628_v19 = vrot.slane %v611_v4, %v598_v57 }
  0x4c   : > { %1075 = vperm.xlu0 %2261, %v1033_v20   ;;  %771 = vperm.xlu1 %2263, %v741_v21   ;;  %v467_v20 = vrot.slane %v447_v8, %v446_v59  ;;  %v471_v21 = vrot.slane %v451_v9, %v446_v59 }
  0x50   : > { %1085 = vperm.xlu0 %2261, %v1035_v22   ;;  %781 = vperm.xlu1 %2263, %v743_v23   ;;  %v475_v22 = vrot.slane %v455_v10, %v446_v59  ;;  %v479_v23 = vrot.slane %v459_v11, %v446_v59 }
  0x54   : > { %1095 = vperm.xlu0 %2261, %v1037_v24   ;;  %1050 = vperm.xlu1 %2263, %v1028_v25  }
  0x58   : > { %1105 = vperm.xlu0 %2261, %v1039_v26   ;;  %1060 = vperm.xlu1 %2263, %v1030_v27  }
  0x5c   : > { %1115 = vperm.xlu0 %2261, %v1041_v28   ;;  %1070 = vperm.xlu1 %2263, %v1032_v29  }
  0x60   : > { %1528 = vperm.xlu0 %2261, %v1518_v30   ;;  %1080 = vperm.xlu1 %2263, %v1034_v31  }
  0x64   : > { %1538 = vperm.xlu0 %2261, %v1520_v32   ;;  %1090 = vperm.xlu1 %2263, %v1036_v33  }
  0x68   : > { %1548 = vperm.xlu0 %2261, %v1522_v34   ;;  %1100 = vperm.xlu1 %2263, %v1038_v35  }
  0x6c   : > { %1558 = vperm.xlu0 %2261, %v1524_v36   ;;  %1110 = vperm.xlu1 %2263, %v1040_v37  }
  0x70   : > { %1794 = vperm.xlu0 %2261, %v1788_v38   ;;  %1120 = vperm.xlu1 %2263, %v1042_v39  }
  0x74   : > { %1804 = vperm.xlu0 %2261, %v1790_v40   ;;  %1533 = vperm.xlu1 %2263, %v1519_v41  }
  0x78   : > { %1543 = vperm.xlu1 %2263, %v1521_v42  }
  0x7c   : > { %1553 = vperm.xlu1 %2263, %v1523_v43  }
  0x80   : > { %1563 = vperm.xlu1 %2263, %v1525_v44  }
  0x84   : > { %1799 = vperm.xlu1 %2263, %v1789_v45  }
  0x88   : > { %1809 = vperm.xlu1 %2263, %v1791_v46  }
  0x96   : > { %v498_v49 = vpop.permute.xlu1 %497  ;;  %v582_v50 = vpop.permute.xlu0 %581 }
  0x97   : > { %v548_v25 = vmul.f32 %v2614_v12, %v498_v49  ;;  %v549_v26 = vmul.f32 %v2616_v13, %v498_v49  ;;  %v550_v27 = vmul.f32 %v2618_v14, %v498_v49  ;;  %v551_v28 = vmul.f32 %v2620_v15, %v498_v49 }
  0x98   : > { %v2635_v29 = vmul.f32 %v2622_v16, %v582_v50  ;;  %v633_v30 = vmul.f32 %v2624_v17, %v582_v50  ;;  %v2639_v31 = vmul.f32 %v2626_v18, %v582_v50  ;;  %v635_v32 = vmul.f32 %v2628_v19, %v582_v50 }
  0x9a   : > { %v502_v55 = vpop.permute.xlu1 %501  ;;  %v590_v56 = vpop.permute.xlu0 %589 }
  0x9b   : > { %v552_v34 = vmul.f32 %v2614_v12, %v502_v55  ;;  %v553_v35 = vmul.f32 %v2616_v13, %v502_v55  ;;  %v554_v36 = vmul.f32 %v2618_v14, %v502_v55  ;;  %v555_v37 = vmul.f32 %v2620_v15, %v502_v55 }
  0x9c   : > { %v640_v49 = vmul.f32 %v2622_v16, %v590_v56  ;;  %v641_v50 = vmul.f32 %v2624_v17, %v590_v56  ;;  %v642_v51 = vmul.f32 %v2626_v18, %v590_v56  ;;  %v643_v52 = vmul.f32 %v2628_v19, %v590_v56 }
  0x9f   : > { %v586_v6 = vpop.permute.xlu1 %585  ;;  %v425_v7 = vpop.permute.xlu0 %424 }
  0xa0   : > { %v480_v38 = vmul.f32 %v467_v20, %v425_v7  ;;  %v481_v39 = vmul.f32 %v471_v21, %v425_v7  ;;  %v482_v40 = vmul.f32 %v475_v22, %v425_v7  ;;  %v483_v41 = vmul.f32 %v479_v23, %v425_v7 }
  0xa1   : > { %v636_v53 = vmul.f32 %v2622_v16, %v586_v6  ;;  %v637_v54 = vmul.f32 %v2624_v17, %v586_v6  ;;  %v638_v55 = vmul.f32 %v2626_v18, %v586_v6  ;;  %v639_v57 = vmul.f32 %v2628_v19, %v586_v6 }
  0xa2   : > { %v564_v58 = vadd.f32 %v548_v25, %v480_v38  ;;  %v566_v59 = vadd.f32 %v550_v27, %v482_v40  ;;  %v565_v61 = vadd.f32 %v549_v26, %v481_v39  ;;  %v567_v62 = vadd.f32 %v551_v28, %v483_v41 }
  0xa3   : > { %v430_v33 = vpop.permute.xlu0 %429 }
  0xa4   : > { %v435_v24 = vpop.permute.xlu1 %434  ;;  %v484_v42 = vmul.f32 %v467_v20, %v430_v33  ;;  %v485_v43 = vmul.f32 %v471_v21, %v430_v33  ;;  %v486_v44 = vmul.f32 %v475_v22, %v430_v33  ;;  %v487_v45 = vmul.f32 %v479_v23, %v430_v33 }
  0xa5   : > { %v488_v9 = vmul.f32 %v467_v20, %v435_v24  ;;  %v489_v6 = vmul.f32 %v471_v21, %v435_v24  ;;  %v490_v10 = vmul.f32 %v475_v22, %v435_v24  ;;  %v491_v11 = vmul.f32 %v479_v23, %v435_v24 }
  0xa6   : > { %v568_v63 = vadd.f32 %v552_v34, %v484_v42  ;;  %v570_v0 = vadd.f32 %v554_v36, %v486_v44  ;;  %v569_v2 = vadd.f32 %v553_v35, %v485_v43  ;;  %v571_v3 = vadd.f32 %v555_v37, %v487_v45 }
  0xa7   : > { %v440_v60 = vpop.permute.xlu0 %439  ;;  %v650_v45 = vadd.f32 %v2639_v31, %v566_v59 }
  0xa8   : > { %v492_v25 = vmul.f32 %v467_v20, %v440_v60  ;;  %v493_v26 = vmul.f32 %v471_v21, %v440_v60  ;;  %v494_v27 = vmul.f32 %v475_v22, %v440_v60  ;;  %v495_v28 = vmul.f32 %v479_v23, %v440_v60 }
  0xa9   : > { %v506_v46 = vpop.permute.xlu1 %505  ;;  %v653_v33 = vadd.f32 %v637_v54, %v569_v2  ;;  %v655_v34 = vadd.f32 %v639_v57, %v571_v3  ;;  %v652_v35 = vadd.f32 %v636_v53, %v568_v63  ;;  %v654_v36 = vadd.f32 %v638_v55, %v570_v0 }
  0xaa   : > { %v556_v56 = vmul.f32 %v2614_v12, %v506_v46  ;;  %v557_v4 = vmul.f32 %v2616_v13, %v506_v46  ;;  %v558_v7 = vmul.f32 %v2618_v14, %v506_v46  ;;  %v559_v8 = vmul.f32 %v2620_v15, %v506_v46 }
  0xab   : > { %v676_v41 = vpop.permute.xlu0 %675  ;;  %v649_v21 = vadd.f32 %v633_v30, %v565_v61  ;;  %v651_v22 = vadd.f32 %v635_v32, %v567_v62  ;;  %v648_v23 = vadd.f32 %v2635_v29, %v564_v58 }
  0xac   : > { %v572_v37 = vadd.f32 %v556_v56, %v488_v9  ;;  %v573_v38 = vadd.f32 %v557_v4, %v489_v6  ;;  %v574_v39 = vadd.f32 %v558_v7, %v490_v10  ;;  %v575_v40 = vadd.f32 %v559_v8, %v491_v11 }
  0xad   : > { %v510_v1 = vpop.permute.xlu1 %509  ;;  %v693_v46 = vadd.f32 %v676_v41, %v653_v33  ;;  %v695_v53 = vadd.f32 %v676_v41, %v655_v34  ;;  %v692_v54 = vadd.f32 %v676_v41, %v652_v35  ;;  %v694_v55 = vadd.f32 %v676_v41, %v654_v36 }
  0xae   : > { %v560_v43 = vmul.f32 %v2614_v12, %v510_v1  ;;  %v561_v44 = vmul.f32 %v2616_v13, %v510_v1  ;;  %v562_v24 = vmul.f32 %v2618_v14, %v510_v1  ;;  %v563_v20 = vmul.f32 %v2620_v15, %v510_v1 }
  0xaf   : > { %v656_v57 = vadd.f32 %v640_v49, %v572_v37  ;;  %v657_v60 = vadd.f32 %v641_v50, %v573_v38  ;;  %v658_v63 = vadd.f32 %v642_v51, %v574_v39  ;;  %v659_v12 = vadd.f32 %v643_v52, %v575_v40 }
  0xb0   : > { %v576_v0 = vadd.f32 %v560_v43, %v492_v25  ;;  %v577_v13 = vadd.f32 %v561_v44, %v493_v26  ;;  %v578_v2 = vadd.f32 %v562_v24, %v494_v27  ;;  %v579_v14 = vadd.f32 %v563_v20, %v495_v28 }
  0xb1   : > { %v709_v1 = vmax.f32 %v693_v46, 0.0  ;;  %v711_v56 = vmax.f32 %v695_v53, 0.0  ;;  %v708_v4 = vmax.f32 %v692_v54, 0.0  ;;  %v710_v7 = vmax.f32 %v694_v55, 0.0  ;;  %v2266_v46 = vld [vmem:[%s2843_s3 + $0x10] sm:$0xff]   ;;  %v2267_v53 = vld [vmem:[%s2843_s3 + $0x18] sm:$0xff]   ;;  %v747_v54 = vpop.permute.xlu0 %746 }
  0xb2   : > { %v594_v42 = vpop.permute.xlu1 %593 }
  0xb3   : > { %v644_v29 = vmul.f32 %v2622_v16, %v594_v42  ;;  %v645_v31 = vmul.f32 %v2624_v17, %v594_v42  ;;  %v646_v58 = vmul.f32 %v2626_v18, %v594_v42  ;;  %v647_v49 = vmul.f32 %v2628_v19, %v594_v42 }
  0xb5   : > { %v660_v18 = vadd.f32 %v644_v29, %v576_v0  ;;  %v661_v26 = vadd.f32 %v645_v31, %v577_v13  ;;  %v662_v19 = vadd.f32 %v646_v58, %v578_v2  ;;  %v663_v27 = vadd.f32 %v647_v49, %v579_v14 }
  0xb7   : > { %v671_v3 = vpop.permute.xlu1 %670 }
  0xb8   : > { %v689_v15 = vadd.f32 %v671_v3, %v649_v21  ;;  %v691_v30 = vadd.f32 %v671_v3, %v651_v22  ;;  %v688_v32 = vadd.f32 %v671_v3, %v648_v23  ;;  %v690_v61 = vadd.f32 %v671_v3, %v650_v45  ;;  %v2264_v23 = vld [vmem:[%s2843_s3] sm:$0xff]   ;;  %v2265_v45 = vld [vmem:[%s2843_s3 + $0x8] sm:$0xff]  }
  0xba   : > { %v705_v50 = vmax.f32 %v689_v15, 0.0  ;;  %v707_v51 = vmax.f32 %v691_v30, 0.0  ;;  %v704_v52 = vmax.f32 %v688_v32, 0.0  ;;  %v706_v59 = vmax.f32 %v690_v61, 0.0 }
  0xbb   : > { %v681_v62 = vpop.permute.xlu1 %680 }
  0xbc   : > { %v696_v8 = vadd.f32 %v681_v62, %v656_v57  ;;  %v697_v9 = vadd.f32 %v681_v62, %v657_v60  ;;  %v698_v6 = vadd.f32 %v681_v62, %v658_v63  ;;  %v699_v10 = vadd.f32 %v681_v62, %v659_v12 }
  0xbd   : > { %v729_v16 = vpack.c.bf16 %v709_v1, %v705_v50  ;;  %v731_v11 = vpack.c.bf16 %v711_v56, %v707_v51  ;;  %v728_v17 = vpack.c.bf16 %v708_v4, %v704_v52  ;;  %v730_v25 = vpack.c.bf16 %v710_v7, %v706_v59  ;;  %v757_v4 = vpop.permute.xlu0 %756 }
  0xbe   : > { %v713_v37 = vmax.f32 %v697_v9, 0.0  ;;  %v715_v38 = vmax.f32 %v699_v10, 0.0  ;;  %v712_v39 = vmax.f32 %v696_v8, 0.0  ;;  %v714_v40 = vmax.f32 %v698_v6, 0.0 }
  0xbf   : > { %817 = vmatprep.subr.bf16.mxu0 %v729_v16  ;;  %890 = vmatprep.subr.bf16.mxu1 %v731_v11  ;;  %v686_v28 = vpop.permute.xlu1 %685 }
  0xc0   : > { %v700_v33 = vadd.f32 %v686_v28, %v660_v18  ;;  %v701_v34 = vadd.f32 %v686_v28, %v661_v26  ;;  %v702_v35 = vadd.f32 %v686_v28, %v662_v19  ;;  %v703_v36 = vadd.f32 %v686_v28, %v663_v27  ;;  %818 = vmatpush1.bf16.msra.mxu0 %v728_v17 }
  0xc1   : > { %891 = vmatpush1.bf16.msra.mxu1 %v730_v25 }
  0xc2   : > { %v717_v41 = vmax.f32 %v701_v34, 0.0  ;;  %v719_v42 = vmax.f32 %v703_v36, 0.0  ;;  %v716_v43 = vmax.f32 %v700_v33, 0.0  ;;  %v718_v44 = vmax.f32 %v702_v35, 0.0 }
  0xc3   : > { %v752_v55 = vpop.permute.xlu1 %751 }
  0xc4   : > { %v733_v24 = vpack.c.bf16 %v717_v41, %v713_v37  ;;  %v735_v20 = vpack.c.bf16 %v719_v42, %v715_v38  ;;  %v732_v21 = vpack.c.bf16 %v716_v43, %v712_v39  ;;  %v734_v22 = vpack.c.bf16 %v718_v44, %v714_v40 }
  0xc6   : > { %819 = vmatprep.subr.bf16.mxu0 %v733_v24  ;;  %892 = vmatprep.subr.bf16.mxu1 %v735_v20 }
  0xc7   : > { %820 = vmatpush1.bf16.msra.mxu0 %v732_v21  ;;  %893 = vmatpush1.bf16.msra.mxu1 %v734_v22  ;;  %v762_v7 = vpop.permute.xlu1 %761  ;;  %v767_v22 = vpop.permute.xlu0 %766 }
  0xca   : > { %2163 = vmatmul.mubr.msk.bf16.vlgmr.msra.gmra.mrb[0].mxu0 %vm804_vm0, %v2264_v23  ;;  %2167 = vmatmul.mubr.msk.bf16.vlgmr.msra.gmra.mrb[0].mxu1 %vm804_vm0, %v2264_v23 }
  0xcb   : > { %859 = vmatprep.mubr.bf16.mxu0 %v2348_v5  ;;  %932 = vmatprep.mubr.bf16.mxu1 %v2348_v5  ;;  %v772_v23 = vpop.permute.xlu1 %771 }
  0xd2   : > { %2164 = vmatmul.mubr.msk.bf16.gmra.mrb[4].mxu0 %vm804_vm0, %v2265_v45  ;;  %2168 = vmatmul.mubr.msk.bf16.gmra.mrb[4].mxu1 %vm804_vm0, %v2265_v45 }
  0xd3   : > { %869 = vmatprep.mubr.bf16.mxu0 %v2348_v5  ;;  %942 = vmatprep.mubr.bf16.mxu1 %v2348_v5 }
  0xda   : > { %2165 = vmatmul.mubr.msk.bf16.gmra.mrb[8].mxu0 %vm804_vm0, %v2266_v46  ;;  %2169 = vmatmul.mubr.msk.bf16.gmra.mrb[8].mxu1 %vm804_vm0, %v2266_v46 }
  0xdb   : > { %879 = vmatprep.mubr.bf16.mxu0 %v2348_v5  ;;  %952 = vmatprep.mubr.bf16.mxu1 %v2348_v5 }
  0xe2   : > { %2166 = vmatmul.mubr.msk.bf16.gmra.mrb[12].mxu0 %vm804_vm0, %v2267_v53  ;;  %2170 = vmatmul.mubr.msk.bf16.gmra.mrb[12].mxu1 %vm804_vm0, %v2267_v53 }
  0xe3   : > { %1220 = vmatprep.mubr.bf16.mxu0 %v2348_v5  ;;  %1333 = vmatprep.mubr.bf16.mxu1 %v2348_v5 }
 0x19d   : > { %v851_v57 = vpop.f32.mrb[0].mxu0  ;;  %v924_v60 = vpop.f32.mrb[0].mxu1 }
 0x19e   : > { %v852_v63 = vadd.f32 %v851_v57, %v747_v54  ;;  %v925_v12 = vadd.f32 %v924_v60, %v747_v54  ;;  %v853_v0 = vpop.f32.mrb[1].mxu0  ;;  %v926_v13 = vpop.f32.mrb[1].mxu1 }
 0x19f   : > { %v854_v2 = vadd.f32 %v853_v0, %v747_v54  ;;  %v927_v14 = vadd.f32 %v926_v13, %v747_v54  ;;  %v855_v3 = vpop.f32.mrb[2].mxu0  ;;  %v928_v15 = vpop.f32.mrb[2].mxu1 }
 0x1a0   : > { %v856_v30 = vadd.f32 %v855_v3, %v752_v55  ;;  %v929_v32 = vadd.f32 %v928_v15, %v752_v55  ;;  %v857_v61 = vpop.f32.mrb[3].mxu0  ;;  %v930_v29 = vpop.f32.mrb[3].mxu1  ;;  %v963_v49 = vmax.f32 %v852_v63, 0.0  ;;  %v965_v50 = vmax.f32 %v925_v12, 0.0 }
 0x1a1   : > { %v858_v31 = vadd.f32 %v857_v61, %v752_v55  ;;  %v931_v58 = vadd.f32 %v930_v29, %v752_v55  ;;  %v964_v59 = vmax.f32 %v854_v2, 0.0  ;;  %v966_v62 = vmax.f32 %v927_v14, 0.0 }
 0x1a2   : > { %v967_v51 = vmax.f32 %v856_v30, 0.0  ;;  %v969_v52 = vmax.f32 %v929_v32, 0.0 }
 0x1a3   : > { %v968_v1 = vmax.f32 %v858_v31, 0.0  ;;  %v970_v56 = vmax.f32 %v931_v58, 0.0 }
 0x1a4   : > { %v1011_v8 = vpack.c.bf16 %v967_v51, %v963_v49  ;;  %v1013_v9 = vpack.c.bf16 %v969_v52, %v965_v50 }
 0x1a5   : > { %v1012_v6 = vpack.c.bf16 %v968_v1, %v964_v59  ;;  %v1014_v10 = vpack.c.bf16 %v970_v56, %v966_v62  ;;  %v861_v16 = vpop.f32.mrb[4].mxu0  ;;  %v934_v11 = vpop.f32.mrb[4].mxu1 }
 0x1a6   : > { %v862_v17 = vadd.f32 %v861_v16, %v757_v4  ;;  %v935_v25 = vadd.f32 %v934_v11, %v757_v4  ;;  %v863_v18 = vpop.f32.mrb[5].mxu0  ;;  %v936_v26 = vpop.f32.mrb[5].mxu1 }
 0x1a7   : > { %v864_v19 = vadd.f32 %v863_v18, %v757_v4  ;;  %v937_v27 = vadd.f32 %v936_v26, %v757_v4  ;;  %v865_v28 = vpop.f32.mrb[6].mxu0  ;;  %v938_v33 = vpop.f32.mrb[6].mxu1  ;;  %1188 = vmatprep.subr.bf16.mxu0 %v1012_v6  ;;  %1301 = vmatprep.subr.bf16.mxu1 %v1014_v10 }
 0x1a8   : > { %v866_v34 = vadd.f32 %v865_v28, %v762_v7  ;;  %v939_v35 = vadd.f32 %v938_v33, %v762_v7  ;;  %v867_v36 = vpop.f32.mrb[7].mxu0  ;;  %v940_v37 = vpop.f32.mrb[7].mxu1  ;;  %1189 = vmatpush1.bf16.msra.mxu0 %v1011_v8  ;;  %1302 = vmatpush1.bf16.msra.mxu1 %v1013_v9  ;;  %v971_v40 = vmax.f32 %v862_v17, 0.0  ;;  %v973_v41 = vmax.f32 %v935_v25, 0.0 }
 0x1a9   : > { %v868_v38 = vadd.f32 %v867_v36, %v762_v7  ;;  %v941_v39 = vadd.f32 %v940_v37, %v762_v7  ;;  %v972_v44 = vmax.f32 %v864_v19, 0.0  ;;  %v974_v24 = vmax.f32 %v937_v27, 0.0  ;;  %v777_v56 = vpop.permute.xlu0 %776  ;;  %v782_v4 = vpop.permute.xlu1 %781 }
 0x1aa   : > { %v975_v42 = vmax.f32 %v866_v34, 0.0  ;;  %v977_v43 = vmax.f32 %v939_v35, 0.0 }
 0x1ab   : > { %v976_v20 = vmax.f32 %v868_v38, 0.0  ;;  %v978_v21 = vmax.f32 %v941_v39, 0.0 }
 0x1ac   : > { %v1015_v45 = vpack.c.bf16 %v975_v42, %v971_v40  ;;  %v1017_v46 = vpack.c.bf16 %v977_v43, %v973_v41 }
 0x1ad   : > { %v1016_v53 = vpack.c.bf16 %v976_v20, %v972_v44  ;;  %v1018_v54 = vpack.c.bf16 %v978_v21, %v974_v24  ;;  %v871_v55 = vpop.f32.mrb[8].mxu0  ;;  %v944_v57 = vpop.f32.mrb[8].mxu1 }
 0x1ae   : > { %v872_v60 = vadd.f32 %v871_v55, %v767_v22  ;;  %v945_v63 = vadd.f32 %v944_v57, %v767_v22  ;;  %v873_v12 = vpop.f32.mrb[9].mxu0  ;;  %v946_v0 = vpop.f32.mrb[9].mxu1  ;;  %v2271_v55 = vld [vmem:[%s2845_s5 + $0x18] sm:$0xff]   ;;  %v2272_v57 = vld [vmem:[%s2845_s5 + $0x20] sm:$0xff]  }
 0x1af   : > { %v874_v13 = vadd.f32 %v873_v12, %v767_v22  ;;  %v947_v2 = vadd.f32 %v946_v0, %v767_v22  ;;  %v875_v14 = vpop.f32.mrb[10].mxu0  ;;  %v948_v3 = vpop.f32.mrb[10].mxu1  ;;  %1190 = vmatprep.subr.bf16.mxu0 %v1016_v53  ;;  %1303 = vmatprep.subr.bf16.mxu1 %v1018_v54  ;;  %v2269_v53 = vld [vmem:[%s2845_s5 + $0x8] sm:$0xff]   ;;  %v2270_v54 = vld [vmem:[%s2845_s5 + $0x10] sm:$0xff]   ;;  %v2275_v12 = vld [vmem:[%s2845_s5 + $0x38] sm:$0xff]  }
 0x1b0   : > { %v876_v15 = vadd.f32 %v875_v14, %v772_v23  ;;  %v949_v30 = vadd.f32 %v948_v3, %v772_v23  ;;  %v877_v32 = vpop.f32.mrb[11].mxu0  ;;  %v950_v61 = vpop.f32.mrb[11].mxu1  ;;  %1191 = vmatpush1.bf16.msra.mxu0 %v1015_v45  ;;  %1304 = vmatpush1.bf16.msra.mxu1 %v1017_v46  ;;  %v979_v58 = vmax.f32 %v872_v60, 0.0  ;;  %v981_v49 = vmax.f32 %v945_v63, 0.0  ;;  %v2268_v46 = vld [vmem:[%s2845_s5] sm:$0xff]   ;;  %v2273_v60 = vld [vmem:[%s2845_s5 + $0x28] sm:$0xff]  }
 0x1b1   : > { %v878_v29 = vadd.f32 %v877_v32, %v772_v23  ;;  %v951_v31 = vadd.f32 %v950_v61, %v772_v23  ;;  %v980_v52 = vmax.f32 %v874_v13, 0.0  ;;  %v982_v59 = vmax.f32 %v947_v2, 0.0  ;;  %v2274_v63 = vld [vmem:[%s2845_s5 + $0x30] sm:$0xff]   ;;  %v1046_v0 = vpop.permute.xlu0 %1045  ;;  %v1051_v13 = vpop.permute.xlu1 %1050 }
 0x1b2   : > { %v983_v50 = vmax.f32 %v876_v15, 0.0  ;;  %v985_v51 = vmax.f32 %v949_v30, 0.0 }
 0x1b3   : > { %v984_v62 = vmax.f32 %v878_v29, 0.0  ;;  %v986_v1 = vmax.f32 %v951_v31, 0.0 }
 0x1b4   : > { %v1019_v7 = vpack.c.bf16 %v983_v50, %v979_v58  ;;  %v1021_v8 = vpack.c.bf16 %v985_v51, %v981_v49 }
 0x1b5   : > { %v1020_v9 = vpack.c.bf16 %v984_v62, %v980_v52  ;;  %v1022_v6 = vpack.c.bf16 %v986_v1, %v982_v59  ;;  %v881_v10 = vpop.f32.mrb[12].mxu0  ;;  %v954_v16 = vpop.f32.mrb[12].mxu1 }
 0x1b6   : > { %v882_v11 = vadd.f32 %v881_v10, %v777_v56  ;;  %v955_v17 = vadd.f32 %v954_v16, %v777_v56  ;;  %v883_v25 = vpop.f32.mrb[13].mxu0  ;;  %v956_v18 = vpop.f32.mrb[13].mxu1 }
 0x1b7   : > { %v884_v26 = vadd.f32 %v883_v25, %v777_v56  ;;  %v957_v19 = vadd.f32 %v956_v18, %v777_v56  ;;  %v885_v27 = vpop.f32.mrb[14].mxu0  ;;  %v958_v28 = vpop.f32.mrb[14].mxu1  ;;  %1192 = vmatprep.subr.bf16.mxu0 %v1020_v9  ;;  %1305 = vmatprep.subr.bf16.mxu1 %v1022_v6 }
 0x1b8   : > { %v886_v33 = vadd.f32 %v885_v27, %v782_v4  ;;  %v959_v34 = vadd.f32 %v958_v28, %v782_v4  ;;  %v887_v35 = vpop.f32.mrb[15].mxu0  ;;  %v960_v36 = vpop.f32.mrb[15].mxu1  ;;  %1193 = vmatpush1.bf16.msra.mxu0 %v1019_v7  ;;  %1306 = vmatpush1.bf16.msra.mxu1 %v1021_v8  ;;  %v987_v39 = vmax.f32 %v882_v11, 0.0  ;;  %v989_v40 = vmax.f32 %v955_v17, 0.0 }
 0x1b9   : > { %v888_v37 = vadd.f32 %v887_v35, %v782_v4  ;;  %v961_v38 = vadd.f32 %v960_v36, %v782_v4  ;;  %v988_v43 = vmax.f32 %v884_v26, 0.0  ;;  %v990_v44 = vmax.f32 %v957_v19, 0.0  ;;  %v1056_v16 = vpop.permute.xlu0 %1055  ;;  %v1061_v11 = vpop.permute.xlu1 %1060 }
 0x1ba   : > { %v991_v41 = vmax.f32 %v886_v33, 0.0  ;;  %v993_v42 = vmax.f32 %v959_v34, 0.0 }
 0x1bb   : > { %v992_v24 = vmax.f32 %v888_v37, 0.0  ;;  %v994_v20 = vmax.f32 %v961_v38, 0.0 }
 0x1bc   : > { %v1023_v21 = vpack.c.bf16 %v991_v41, %v987_v39  ;;  %v1025_v22 = vpack.c.bf16 %v993_v42, %v989_v40 }
 0x1bd   : > { %v1024_v23 = vpack.c.bf16 %v992_v24, %v988_v43  ;;  %v1026_v45 = vpack.c.bf16 %v994_v20, %v990_v44 }
 0x1bf   : > { %1194 = vmatprep.subr.bf16.mxu0 %v1024_v23  ;;  %1307 = vmatprep.subr.bf16.mxu1 %v1026_v45 }
 0x1c0   : > { %1195 = vmatpush1.bf16.msra.mxu0 %v1023_v21  ;;  %1308 = vmatpush1.bf16.msra.mxu1 %v1025_v22 }
 0x1c3   : > { %2179 = vmatmul.mubr.msk.bf16.vlgmr.msra.gmra.mrb[16].mxu0 %vm1163_vm1, %v2268_v46  ;;  %2187 = vmatmul.mubr.msk.bf16.vlgmr.msra.gmra.mrb[16].mxu1 %vm1163_vm1, %v2268_v46 }
 0x1c4   : > { %1230 = vmatprep.mubr.bf16.mxu0 %v2348_v5  ;;  %1343 = vmatprep.mubr.bf16.mxu1 %v2348_v5 }
 0x1cb   : > { %2180 = vmatmul.mubr.msk.bf16.gmra.mrb[20].mxu0 %vm1163_vm1, %v2269_v53  ;;  %2188 = vmatmul.mubr.msk.bf16.gmra.mrb[20].mxu1 %vm1163_vm1, %v2269_v53 }
 0x1cc   : > { %1240 = vmatprep.mubr.bf16.mxu0 %v2348_v5  ;;  %1353 = vmatprep.mubr.bf16.mxu1 %v2348_v5 }
 0x1d3   : > { %2181 = vmatmul.mubr.msk.bf16.gmra.mrb[24].mxu0 %vm1163_vm1, %v2270_v54  ;;  %2189 = vmatmul.mubr.msk.bf16.gmra.mrb[24].mxu1 %vm1163_vm1, %v2270_v54 }
 0x1d4   : > { %1250 = vmatprep.mubr.bf16.mxu0 %v2348_v5  ;;  %1363 = vmatprep.mubr.bf16.mxu1 %v2348_v5 }
 0x1db   : > { %2182 = vmatmul.mubr.msk.bf16.gmra.mrb[28].mxu0 %vm1163_vm1, %v2271_v55  ;;  %2190 = vmatmul.mubr.msk.bf16.gmra.mrb[28].mxu1 %vm1163_vm1, %v2271_v55  ;;  %v1066_v55 = vpop.permute.xlu0 %1065 }
 0x1dc   : > { %1260 = vmatprep.mubr.bf16.mxu0 %v2348_v5  ;;  %1373 = vmatprep.mubr.bf16.mxu1 %v2348_v5 }
 0x1e3   : > { %2183 = vmatmul.mubr.msk.bf16.gmra.mrb[32].mxu0 %vm1163_vm1, %v2272_v57  ;;  %2191 = vmatmul.mubr.msk.bf16.gmra.mrb[32].mxu1 %vm1163_vm1, %v2272_v57  ;;  %v1071_v57 = vpop.permute.xlu1 %1070 }
 0x1e4   : > { %1270 = vmatprep.mubr.bf16.mxu0 %v2348_v5  ;;  %1383 = vmatprep.mubr.bf16.mxu1 %v2348_v5 }
 0x1eb   : > { %2184 = vmatmul.mubr.msk.bf16.gmra.mrb[36].mxu0 %vm1163_vm1, %v2273_v60  ;;  %2192 = vmatmul.mubr.msk.bf16.gmra.mrb[36].mxu1 %vm1163_vm1, %v2273_v60 }
 0x1ec   : > { %1280 = vmatprep.mubr.bf16.mxu0 %v2348_v5  ;;  %1393 = vmatprep.mubr.bf16.mxu1 %v2348_v5 }
 0x1f3   : > { %2185 = vmatmul.mubr.msk.bf16.gmra.mrb[40].mxu0 %vm1163_vm1, %v2274_v63  ;;  %2193 = vmatmul.mubr.msk.bf16.gmra.mrb[40].mxu1 %vm1163_vm1, %v2274_v63 }
 0x1f4   : > { %1290 = vmatprep.mubr.bf16.mxu0 %v2348_v5  ;;  %1403 = vmatprep.mubr.bf16.mxu1 %v2348_v5 }
 0x1fb   : > { %2186 = vmatmul.mubr.msk.bf16.gmra.mrb[44].mxu0 %vm1163_vm1, %v2275_v12  ;;  %2194 = vmatmul.mubr.msk.bf16.gmra.mrb[44].mxu1 %vm1163_vm1, %v2275_v12 }
 0x1fc   : > { %1622 = vmatprep.mubr.bf16.mxu0 %v2348_v5  ;;  %1695 = vmatprep.mubr.bf16.mxu1 %v2348_v5 }
 0x296   : > { %v1222_v2 = vpop.f32.mrb[16].mxu0  ;;  %v1335_v14 = vpop.f32.mrb[16].mxu1 }
 0x297   : > { %v1223_v3 = vadd.f32 %v1222_v2, %v1046_v0  ;;  %v1336_v15 = vadd.f32 %v1335_v14, %v1046_v0  ;;  %v1224_v30 = vpop.f32.mrb[17].mxu0  ;;  %v1337_v32 = vpop.f32.mrb[17].mxu1 }
 0x298   : > { %v1225_v61 = vadd.f32 %v1224_v30, %v1046_v0  ;;  %v1338_v29 = vadd.f32 %v1337_v32, %v1046_v0  ;;  %v1226_v31 = vpop.f32.mrb[18].mxu0  ;;  %v1339_v58 = vpop.f32.mrb[18].mxu1 }
 0x299   : > { %v1227_v49 = vadd.f32 %v1226_v31, %v1051_v13  ;;  %v1340_v50 = vadd.f32 %v1339_v58, %v1051_v13  ;;  %v1228_v51 = vpop.f32.mrb[19].mxu0  ;;  %v1341_v52 = vpop.f32.mrb[19].mxu1  ;;  %v1414_v1 = vmax.f32 %v1223_v3, 0.0  ;;  %v1416_v56 = vmax.f32 %v1336_v15, 0.0 }
 0x29a   : > { %v1229_v59 = vadd.f32 %v1228_v51, %v1051_v13  ;;  %v1342_v62 = vadd.f32 %v1341_v52, %v1051_v13  ;;  %v1415_v8 = vmax.f32 %v1225_v61, 0.0  ;;  %v1417_v9 = vmax.f32 %v1338_v29, 0.0 }
 0x29b   : > { %v1418_v4 = vmax.f32 %v1227_v49, 0.0  ;;  %v1420_v7 = vmax.f32 %v1340_v50, 0.0 }
 0x29c   : > { %v1419_v6 = vmax.f32 %v1229_v59, 0.0  ;;  %v1421_v10 = vmax.f32 %v1342_v62, 0.0 }
 0x29d   : > { %v1486_v17 = vpack.c.bf16 %v1418_v4, %v1414_v1  ;;  %v1488_v25 = vpack.c.bf16 %v1420_v7, %v1416_v56 }
 0x29e   : > { %v1487_v18 = vpack.c.bf16 %v1419_v6, %v1415_v8  ;;  %v1489_v26 = vpack.c.bf16 %v1421_v10, %v1417_v9  ;;  %v1232_v19 = vpop.f32.mrb[20].mxu0  ;;  %v1345_v27 = vpop.f32.mrb[20].mxu1 }
 0x29f   : > { %v1233_v28 = vadd.f32 %v1232_v19, %v1056_v16  ;;  %v1346_v33 = vadd.f32 %v1345_v27, %v1056_v16  ;;  %v1234_v34 = vpop.f32.mrb[21].mxu0  ;;  %v1347_v35 = vpop.f32.mrb[21].mxu1 }
 0x2a0   : > { %v1235_v36 = vadd.f32 %v1234_v34, %v1056_v16  ;;  %v1348_v37 = vadd.f32 %v1347_v35, %v1056_v16  ;;  %v1236_v38 = vpop.f32.mrb[22].mxu0  ;;  %v1349_v39 = vpop.f32.mrb[22].mxu1  ;;  %1590 = vmatprep.subr.bf16.mxu0 %v1487_v18  ;;  %1663 = vmatprep.subr.bf16.mxu1 %v1489_v26 }
 0x2a1   : > { %v1237_v40 = vadd.f32 %v1236_v38, %v1061_v11  ;;  %v1350_v41 = vadd.f32 %v1349_v39, %v1061_v11  ;;  %v1238_v42 = vpop.f32.mrb[23].mxu0  ;;  %v1351_v43 = vpop.f32.mrb[23].mxu1  ;;  %1591 = vmatpush1.bf16.msra.mxu0 %v1486_v17  ;;  %1664 = vmatpush1.bf16.msra.mxu1 %v1488_v25  ;;  %v1422_v20 = vmax.f32 %v1233_v28, 0.0  ;;  %v1424_v21 = vmax.f32 %v1346_v33, 0.0 }
 0x2a2   : > { %v1239_v44 = vadd.f32 %v1238_v42, %v1061_v11  ;;  %v1352_v24 = vadd.f32 %v1351_v43, %v1061_v11  ;;  %v1423_v45 = vmax.f32 %v1235_v36, 0.0  ;;  %v1425_v46 = vmax.f32 %v1348_v37, 0.0  ;;  %v1076_v10 = vpop.permute.xlu0 %1075  ;;  %v1081_v16 = vpop.permute.xlu1 %1080 }
 0x2a3   : > { %v1426_v22 = vmax.f32 %v1237_v40, 0.0  ;;  %v1428_v23 = vmax.f32 %v1350_v41, 0.0 }
 0x2a4   : > { %v1427_v53 = vmax.f32 %v1239_v44, 0.0  ;;  %v1429_v54 = vmax.f32 %v1352_v24, 0.0 }
 0x2a5   : > { %v1490_v60 = vpack.c.bf16 %v1426_v22, %v1422_v20  ;;  %v1492_v63 = vpack.c.bf16 %v1428_v23, %v1424_v21 }
 0x2a6   : > { %v1491_v12 = vpack.c.bf16 %v1427_v53, %v1423_v45  ;;  %v1493_v0 = vpack.c.bf16 %v1429_v54, %v1425_v46  ;;  %v1242_v13 = vpop.f32.mrb[24].mxu0  ;;  %v1355_v2 = vpop.f32.mrb[24].mxu1 }
 0x2a7   : > { %v1243_v14 = vadd.f32 %v1242_v13, %v1066_v55  ;;  %v1356_v3 = vadd.f32 %v1355_v2, %v1066_v55  ;;  %v1244_v15 = vpop.f32.mrb[25].mxu0  ;;  %v1357_v30 = vpop.f32.mrb[25].mxu1 }
 0x2a8   : > { %v1245_v32 = vadd.f32 %v1244_v15, %v1066_v55  ;;  %v1358_v61 = vadd.f32 %v1357_v30, %v1066_v55  ;;  %v1246_v29 = vpop.f32.mrb[26].mxu0  ;;  %v1359_v31 = vpop.f32.mrb[26].mxu1  ;;  %1592 = vmatprep.subr.bf16.mxu0 %v1491_v12  ;;  %1665 = vmatprep.subr.bf16.mxu1 %v1493_v0 }
 0x2a9   : > { %v1247_v58 = vadd.f32 %v1246_v29, %v1071_v57  ;;  %v1360_v49 = vadd.f32 %v1359_v31, %v1071_v57  ;;  %v1248_v50 = vpop.f32.mrb[27].mxu0  ;;  %v1361_v51 = vpop.f32.mrb[27].mxu1  ;;  %1593 = vmatpush1.bf16.msra.mxu0 %v1490_v60  ;;  %1666 = vmatpush1.bf16.msra.mxu1 %v1492_v63  ;;  %v1430_v62 = vmax.f32 %v1243_v14, 0.0  ;;  %v1432_v1 = vmax.f32 %v1356_v3, 0.0 }
 0x2aa   : > { %v1249_v52 = vadd.f32 %v1248_v50, %v1071_v57  ;;  %v1362_v59 = vadd.f32 %v1361_v51, %v1071_v57  ;;  %v1431_v7 = vmax.f32 %v1245_v32, 0.0  ;;  %v1433_v8 = vmax.f32 %v1358_v61, 0.0  ;;  %v1086_v54 = vpop.permute.xlu0 %1085  ;;  %v1091_v55 = vpop.permute.xlu1 %1090 }
 0x2ab   : > { %v1434_v56 = vmax.f32 %v1247_v58, 0.0  ;;  %v1436_v4 = vmax.f32 %v1360_v49, 0.0 }
 0x2ac   : > { %v1435_v9 = vmax.f32 %v1249_v52, 0.0  ;;  %v1437_v6 = vmax.f32 %v1362_v59, 0.0 }
 0x2ad   : > { %v1494_v11 = vpack.c.bf16 %v1434_v56, %v1430_v62  ;;  %v1496_v17 = vpack.c.bf16 %v1436_v4, %v1432_v1 }
 0x2ae   : > { %v1495_v25 = vpack.c.bf16 %v1435_v9, %v1431_v7  ;;  %v1497_v18 = vpack.c.bf16 %v1437_v6, %v1433_v8  ;;  %v1252_v26 = vpop.f32.mrb[28].mxu0  ;;  %v1365_v19 = vpop.f32.mrb[28].mxu1 }
 0x2af   : > { %v1253_v27 = vadd.f32 %v1252_v26, %v1076_v10  ;;  %v1366_v28 = vadd.f32 %v1365_v19, %v1076_v10  ;;  %v1254_v33 = vpop.f32.mrb[29].mxu0  ;;  %v1367_v34 = vpop.f32.mrb[29].mxu1 }
 0x2b0   : > { %v1255_v35 = vadd.f32 %v1254_v33, %v1076_v10  ;;  %v1368_v36 = vadd.f32 %v1367_v34, %v1076_v10  ;;  %v1256_v37 = vpop.f32.mrb[30].mxu0  ;;  %v1369_v38 = vpop.f32.mrb[30].mxu1  ;;  %1594 = vmatprep.subr.bf16.mxu0 %v1495_v25  ;;  %1667 = vmatprep.subr.bf16.mxu1 %v1497_v18 }
 0x2b1   : > { %v1257_v39 = vadd.f32 %v1256_v37, %v1081_v16  ;;  %v1370_v40 = vadd.f32 %v1369_v38, %v1081_v16  ;;  %v1258_v41 = vpop.f32.mrb[31].mxu0  ;;  %v1371_v42 = vpop.f32.mrb[31].mxu1  ;;  %1595 = vmatpush1.bf16.msra.mxu0 %v1494_v11  ;;  %1668 = vmatpush1.bf16.msra.mxu1 %v1496_v17  ;;  %v1438_v24 = vmax.f32 %v1253_v27, 0.0  ;;  %v1440_v20 = vmax.f32 %v1366_v28, 0.0 }
 0x2b2   : > { %v1259_v43 = vadd.f32 %v1258_v41, %v1081_v16  ;;  %v1372_v44 = vadd.f32 %v1371_v42, %v1081_v16  ;;  %v1439_v23 = vmax.f32 %v1255_v35, 0.0  ;;  %v1441_v45 = vmax.f32 %v1368_v36, 0.0  ;;  %v1096_v6 = vpop.permute.xlu0 %1095  ;;  %v1101_v10 = vpop.permute.xlu1 %1100 }
 0x2b3   : > { %v1442_v21 = vmax.f32 %v1257_v39, 0.0  ;;  %v1444_v22 = vmax.f32 %v1370_v40, 0.0 }
 0x2b4   : > { %v1443_v46 = vmax.f32 %v1259_v43, 0.0  ;;  %v1445_v53 = vmax.f32 %v1372_v44, 0.0 }
 0x2b5   : > { %v1498_v57 = vpack.c.bf16 %v1442_v21, %v1438_v24  ;;  %v1500_v60 = vpack.c.bf16 %v1444_v22, %v1440_v20 }
 0x2b6   : > { %v1499_v63 = vpack.c.bf16 %v1443_v46, %v1439_v23  ;;  %v1501_v12 = vpack.c.bf16 %v1445_v53, %v1441_v45  ;;  %v1262_v0 = vpop.f32.mrb[32].mxu0  ;;  %v1375_v13 = vpop.f32.mrb[32].mxu1 }
 0x2b7   : > { %v1263_v2 = vadd.f32 %v1262_v0, %v1086_v54  ;;  %v1376_v14 = vadd.f32 %v1375_v13, %v1086_v54  ;;  %v1264_v3 = vpop.f32.mrb[33].mxu0  ;;  %v1377_v15 = vpop.f32.mrb[33].mxu1 }
 0x2b8   : > { %v1265_v30 = vadd.f32 %v1264_v3, %v1086_v54  ;;  %v1378_v32 = vadd.f32 %v1377_v15, %v1086_v54  ;;  %v1266_v61 = vpop.f32.mrb[34].mxu0  ;;  %v1379_v29 = vpop.f32.mrb[34].mxu1  ;;  %1596 = vmatprep.subr.bf16.mxu0 %v1499_v63  ;;  %1669 = vmatprep.subr.bf16.mxu1 %v1501_v12 }
 0x2b9   : > { %v1267_v31 = vadd.f32 %v1266_v61, %v1091_v55  ;;  %v1380_v58 = vadd.f32 %v1379_v29, %v1091_v55  ;;  %v1268_v49 = vpop.f32.mrb[35].mxu0  ;;  %v1381_v50 = vpop.f32.mrb[35].mxu1  ;;  %1597 = vmatpush1.bf16.msra.mxu0 %v1498_v57  ;;  %1670 = vmatpush1.bf16.msra.mxu1 %v1500_v60  ;;  %v1446_v59 = vmax.f32 %v1263_v2, 0.0  ;;  %v1448_v62 = vmax.f32 %v1376_v14, 0.0 }
 0x2ba   : > { %v1269_v51 = vadd.f32 %v1268_v49, %v1091_v55  ;;  %v1382_v52 = vadd.f32 %v1381_v50, %v1091_v55  ;;  %v1447_v4 = vmax.f32 %v1265_v30, 0.0  ;;  %v1449_v7 = vmax.f32 %v1378_v32, 0.0  ;;  %v1106_v53 = vpop.permute.xlu0 %1105  ;;  %v1111_v54 = vpop.permute.xlu1 %1110 }
 0x2bb   : > { %v1450_v1 = vmax.f32 %v1267_v31, 0.0  ;;  %v1452_v56 = vmax.f32 %v1380_v58, 0.0 }
 0x2bc   : > { %v1451_v8 = vmax.f32 %v1269_v51, 0.0  ;;  %v1453_v9 = vmax.f32 %v1382_v52, 0.0 }
 0x2bd   : > { %v1502_v16 = vpack.c.bf16 %v1450_v1, %v1446_v59  ;;  %v1504_v11 = vpack.c.bf16 %v1452_v56, %v1448_v62 }
 0x2be   : > { %v1503_v17 = vpack.c.bf16 %v1451_v8, %v1447_v4  ;;  %v1505_v25 = vpack.c.bf16 %v1453_v9, %v1449_v7  ;;  %v1272_v18 = vpop.f32.mrb[36].mxu0  ;;  %v1385_v26 = vpop.f32.mrb[36].mxu1 }
 0x2bf   : > { %v1273_v19 = vadd.f32 %v1272_v18, %v1096_v6  ;;  %v1386_v27 = vadd.f32 %v1385_v26, %v1096_v6  ;;  %v1274_v28 = vpop.f32.mrb[37].mxu0  ;;  %v1387_v33 = vpop.f32.mrb[37].mxu1 }
 0x2c0   : > { %v1275_v34 = vadd.f32 %v1274_v28, %v1096_v6  ;;  %v1388_v35 = vadd.f32 %v1387_v33, %v1096_v6  ;;  %v1276_v36 = vpop.f32.mrb[38].mxu0  ;;  %v1389_v37 = vpop.f32.mrb[38].mxu1  ;;  %1598 = vmatprep.subr.bf16.mxu0 %v1503_v17  ;;  %1671 = vmatprep.subr.bf16.mxu1 %v1505_v25 }
 0x2c1   : > { %v1277_v38 = vadd.f32 %v1276_v36, %v1101_v10  ;;  %v1390_v39 = vadd.f32 %v1389_v37, %v1101_v10  ;;  %v1278_v40 = vpop.f32.mrb[39].mxu0  ;;  %v1391_v41 = vpop.f32.mrb[39].mxu1  ;;  %1599 = vmatpush1.bf16.msra.mxu0 %v1502_v16  ;;  %1672 = vmatpush1.bf16.msra.mxu1 %v1504_v11  ;;  %v1454_v44 = vmax.f32 %v1273_v19, 0.0  ;;  %v1456_v24 = vmax.f32 %v1386_v27, 0.0 }
 0x2c2   : > { %v1279_v42 = vadd.f32 %v1278_v40, %v1101_v10  ;;  %v1392_v43 = vadd.f32 %v1391_v41, %v1101_v10  ;;  %v1455_v22 = vmax.f32 %v1275_v34, 0.0  ;;  %v1457_v23 = vmax.f32 %v1388_v35, 0.0  ;;  %v1116_v9 = vpop.permute.xlu0 %1115  ;;  %v1121_v6 = vpop.permute.xlu1 %1120 }
 0x2c3   : > { %v1458_v20 = vmax.f32 %v1277_v38, 0.0  ;;  %v1460_v21 = vmax.f32 %v1390_v39, 0.0 }
 0x2c4   : > { %v1459_v45 = vmax.f32 %v1279_v42, 0.0  ;;  %v1461_v46 = vmax.f32 %v1392_v43, 0.0 }
 0x2c5   : > { %v1506_v55 = vpack.c.bf16 %v1458_v20, %v1454_v44  ;;  %v1508_v57 = vpack.c.bf16 %v1460_v21, %v1456_v24 }
 0x2c6   : > { %v1507_v60 = vpack.c.bf16 %v1459_v45, %v1455_v22  ;;  %v1509_v63 = vpack.c.bf16 %v1461_v46, %v1457_v23  ;;  %v1282_v12 = vpop.f32.mrb[40].mxu0  ;;  %v1395_v0 = vpop.f32.mrb[40].mxu1 }
 0x2c7   : > { %v1283_v13 = vadd.f32 %v1282_v12, %v1106_v53  ;;  %v1396_v2 = vadd.f32 %v1395_v0, %v1106_v53  ;;  %v1284_v14 = vpop.f32.mrb[41].mxu0  ;;  %v1397_v3 = vpop.f32.mrb[41].mxu1  ;;  %v2279_v12 = vld [vmem:[%s2847_s7 + $0x18] sm:$0xff]  }
 0x2c8   : > { %v1285_v15 = vadd.f32 %v1284_v14, %v1106_v53  ;;  %v1398_v30 = vadd.f32 %v1397_v3, %v1106_v53  ;;  %v1286_v32 = vpop.f32.mrb[42].mxu0  ;;  %v1399_v61 = vpop.f32.mrb[42].mxu1  ;;  %1600 = vmatprep.subr.bf16.mxu0 %v1507_v60  ;;  %1673 = vmatprep.subr.bf16.mxu1 %v1509_v63  ;;  %v2277_v60 = vld [vmem:[%s2847_s7 + $0x8] sm:$0xff]   ;;  %v2278_v63 = vld [vmem:[%s2847_s7 + $0x10] sm:$0xff]  }
 0x2c9   : > { %v1287_v29 = vadd.f32 %v1286_v32, %v1111_v54  ;;  %v1400_v31 = vadd.f32 %v1399_v61, %v1111_v54  ;;  %v1288_v58 = vpop.f32.mrb[43].mxu0  ;;  %v1401_v49 = vpop.f32.mrb[43].mxu1  ;;  %1601 = vmatpush1.bf16.msra.mxu0 %v1506_v55  ;;  %1674 = vmatpush1.bf16.msra.mxu1 %v1508_v57  ;;  %v1462_v52 = vmax.f32 %v1283_v13, 0.0  ;;  %v1464_v59 = vmax.f32 %v1396_v2, 0.0  ;;  %v2276_v57 = vld [vmem:[%s2847_s7] sm:$0xff]  }
 0x2ca   : > { %v1289_v50 = vadd.f32 %v1288_v58, %v1111_v54  ;;  %v1402_v51 = vadd.f32 %v1401_v49, %v1111_v54  ;;  %v1463_v56 = vmax.f32 %v1285_v15, 0.0  ;;  %v1465_v4 = vmax.f32 %v1398_v30, 0.0  ;;  %v1529_v0 = vpop.permute.xlu0 %1528  ;;  %v1534_v13 = vpop.permute.xlu1 %1533 }
 0x2cb   : > { %v1466_v62 = vmax.f32 %v1287_v29, 0.0  ;;  %v1468_v1 = vmax.f32 %v1400_v31, 0.0 }
 0x2cc   : > { %v1467_v7 = vmax.f32 %v1289_v50, 0.0  ;;  %v1469_v8 = vmax.f32 %v1402_v51, 0.0 }
 0x2cd   : > { %v1510_v10 = vpack.c.bf16 %v1466_v62, %v1462_v52  ;;  %v1512_v16 = vpack.c.bf16 %v1468_v1, %v1464_v59 }
 0x2ce   : > { %v1511_v11 = vpack.c.bf16 %v1467_v7, %v1463_v56  ;;  %v1513_v17 = vpack.c.bf16 %v1469_v8, %v1465_v4  ;;  %v1292_v25 = vpop.f32.mrb[44].mxu0  ;;  %v1405_v18 = vpop.f32.mrb[44].mxu1 }
 0x2cf   : > { %v1293_v26 = vadd.f32 %v1292_v25, %v1116_v9  ;;  %v1406_v19 = vadd.f32 %v1405_v18, %v1116_v9  ;;  %v1294_v27 = vpop.f32.mrb[45].mxu0  ;;  %v1407_v28 = vpop.f32.mrb[45].mxu1 }
 0x2d0   : > { %v1295_v33 = vadd.f32 %v1294_v27, %v1116_v9  ;;  %v1408_v34 = vadd.f32 %v1407_v28, %v1116_v9  ;;  %v1296_v35 = vpop.f32.mrb[46].mxu0  ;;  %v1409_v36 = vpop.f32.mrb[46].mxu1  ;;  %1602 = vmatprep.subr.bf16.mxu0 %v1511_v11  ;;  %1675 = vmatprep.subr.bf16.mxu1 %v1513_v17 }
 0x2d1   : > { %v1297_v37 = vadd.f32 %v1296_v35, %v1121_v6  ;;  %v1410_v38 = vadd.f32 %v1409_v36, %v1121_v6  ;;  %v1298_v39 = vpop.f32.mrb[47].mxu0  ;;  %v1411_v40 = vpop.f32.mrb[47].mxu1  ;;  %1603 = vmatpush1.bf16.msra.mxu0 %v1510_v10  ;;  %1676 = vmatpush1.bf16.msra.mxu1 %v1512_v16  ;;  %v1470_v43 = vmax.f32 %v1293_v26, 0.0  ;;  %v1472_v44 = vmax.f32 %v1406_v19, 0.0 }
 0x2d2   : > { %v1299_v41 = vadd.f32 %v1298_v39, %v1121_v6  ;;  %v1412_v42 = vadd.f32 %v1411_v40, %v1121_v6  ;;  %v1471_v21 = vmax.f32 %v1295_v33, 0.0  ;;  %v1473_v22 = vmax.f32 %v1408_v34, 0.0  ;;  %v1539_v16 = vpop.permute.xlu0 %1538  ;;  %v1544_v11 = vpop.permute.xlu1 %1543 }
 0x2d3   : > { %v1474_v24 = vmax.f32 %v1297_v37, 0.0  ;;  %v1476_v20 = vmax.f32 %v1410_v38, 0.0 }
 0x2d4   : > { %v1475_v23 = vmax.f32 %v1299_v41, 0.0  ;;  %v1477_v45 = vmax.f32 %v1412_v42, 0.0 }
 0x2d5   : > { %v1514_v46 = vpack.c.bf16 %v1474_v24, %v1470_v43  ;;  %v1516_v53 = vpack.c.bf16 %v1476_v20, %v1472_v44 }
 0x2d6   : > { %v1515_v54 = vpack.c.bf16 %v1475_v23, %v1471_v21  ;;  %v1517_v55 = vpack.c.bf16 %v1477_v45, %v1473_v22 }
 0x2d8   : > { %1604 = vmatprep.subr.bf16.mxu0 %v1515_v54  ;;  %1677 = vmatprep.subr.bf16.mxu1 %v1517_v55  ;;  %v1549_v55 = vpop.permute.xlu0 %1548 }
 0x2d9   : > { %1605 = vmatpush1.bf16.msra.mxu0 %v1514_v46  ;;  %1678 = vmatpush1.bf16.msra.mxu1 %v1516_v53 }
 0x2dc   : > { %1623 = vmatmul.mubr.bf16.vlgmr.msra.gmra.mrb[48].mxu0 %v2276_v57  ;;  %1696 = vmatmul.mubr.bf16.vlgmr.msra.gmra.mrb[48].mxu1 %v2276_v57  ;;  %v1554_v57 = vpop.permute.xlu1 %1553 }
 0x2dd   : > { %1632 = vmatprep.mubr.bf16.mxu0 %v2348_v5  ;;  %1705 = vmatprep.mubr.bf16.mxu1 %v2348_v5 }
 0x2e4   : > { %1633 = vmatmul.mubr.bf16.gmra.mrb[52].mxu0 %v2277_v60  ;;  %1706 = vmatmul.mubr.bf16.gmra.mrb[52].mxu1 %v2277_v60 }
 0x2e5   : > { %1642 = vmatprep.mubr.bf16.mxu0 %v2348_v5  ;;  %1715 = vmatprep.mubr.bf16.mxu1 %v2348_v5 }
 0x2ec   : > { %1643 = vmatmul.mubr.bf16.gmra.mrb[56].mxu0 %v2278_v63  ;;  %1716 = vmatmul.mubr.bf16.gmra.mrb[56].mxu1 %v2278_v63 }
 0x2ed   : > { %1652 = vmatprep.mubr.bf16.mxu0 %v2348_v5  ;;  %1725 = vmatprep.mubr.bf16.mxu1 %v2348_v5 }
 0x2f4   : > { %1653 = vmatmul.mubr.bf16.gmra.mrb[60].mxu0 %v2279_v12  ;;  %1726 = vmatmul.mubr.bf16.gmra.mrb[60].mxu1 %v2279_v12 }
 0x2f5   : > { %1860 = vmatprep.mubr.bf16.mxu0 %v2348_v5  ;;  %1913 = vmatprep.mubr.bf16.mxu1 %v2348_v5 }
 0x3af   : > { %v1624_v2 = vpop.f32.mrb[48].mxu0  ;;  %v1697_v14 = vpop.f32.mrb[48].mxu1 }
 0x3b0   : > { %v1625_v3 = vadd.f32 %v1624_v2, %v1529_v0  ;;  %v1698_v15 = vadd.f32 %v1697_v14, %v1529_v0  ;;  %v1626_v30 = vpop.f32.mrb[49].mxu0  ;;  %v1699_v32 = vpop.f32.mrb[49].mxu1 }
 0x3b1   : > { %v1627_v61 = vadd.f32 %v1626_v30, %v1529_v0  ;;  %v1700_v29 = vadd.f32 %v1699_v32, %v1529_v0  ;;  %v1628_v31 = vpop.f32.mrb[50].mxu0  ;;  %v1701_v58 = vpop.f32.mrb[50].mxu1 }
 0x3b2   : > { %v1629_v49 = vadd.f32 %v1628_v31, %v1534_v13  ;;  %v1702_v50 = vadd.f32 %v1701_v58, %v1534_v13  ;;  %v1630_v51 = vpop.f32.mrb[51].mxu0  ;;  %v1703_v52 = vpop.f32.mrb[51].mxu1  ;;  %v1736_v1 = vmax.f32 %v1625_v3, 0.0  ;;  %v1738_v56 = vmax.f32 %v1698_v15, 0.0 }
 0x3b3   : > { %v1631_v59 = vadd.f32 %v1630_v51, %v1534_v13  ;;  %v1704_v62 = vadd.f32 %v1703_v52, %v1534_v13  ;;  %v1737_v8 = vmax.f32 %v1627_v61, 0.0  ;;  %v1739_v9 = vmax.f32 %v1700_v29, 0.0 }
 0x3b4   : > { %v1740_v4 = vmax.f32 %v1629_v49, 0.0  ;;  %v1742_v7 = vmax.f32 %v1702_v50, 0.0 }
 0x3b5   : > { %v1741_v6 = vmax.f32 %v1631_v59, 0.0  ;;  %v1743_v10 = vmax.f32 %v1704_v62, 0.0 }
 0x3b6   : > { %v1772_v17 = vpack.c.bf16 %v1740_v4, %v1736_v1  ;;  %v1774_v25 = vpack.c.bf16 %v1742_v7, %v1738_v56 }
 0x3b7   : > { %v1773_v18 = vpack.c.bf16 %v1741_v6, %v1737_v8  ;;  %v1775_v26 = vpack.c.bf16 %v1743_v10, %v1739_v9  ;;  %v1634_v19 = vpop.f32.mrb[52].mxu0  ;;  %v1707_v27 = vpop.f32.mrb[52].mxu1 }
 0x3b8   : > { %v1635_v28 = vadd.f32 %v1634_v19, %v1539_v16  ;;  %v1708_v33 = vadd.f32 %v1707_v27, %v1539_v16  ;;  %v1636_v34 = vpop.f32.mrb[53].mxu0  ;;  %v1709_v35 = vpop.f32.mrb[53].mxu1 }
 0x3b9   : > { %v1637_v36 = vadd.f32 %v1636_v34, %v1539_v16  ;;  %v1710_v37 = vadd.f32 %v1709_v35, %v1539_v16  ;;  %v1638_v38 = vpop.f32.mrb[54].mxu0  ;;  %v1711_v39 = vpop.f32.mrb[54].mxu1  ;;  %1828 = vmatprep.subr.bf16.mxu0 %v1773_v18  ;;  %1881 = vmatprep.subr.bf16.mxu1 %v1775_v26 }
 0x3ba   : > { %v1639_v40 = vadd.f32 %v1638_v38, %v1544_v11  ;;  %v1712_v41 = vadd.f32 %v1711_v39, %v1544_v11  ;;  %v1640_v42 = vpop.f32.mrb[55].mxu0  ;;  %v1713_v43 = vpop.f32.mrb[55].mxu1  ;;  %1829 = vmatpush1.bf16.msra.mxu0 %v1772_v17  ;;  %1882 = vmatpush1.bf16.msra.mxu1 %v1774_v25  ;;  %v1744_v20 = vmax.f32 %v1635_v28, 0.0  ;;  %v1746_v21 = vmax.f32 %v1708_v33, 0.0 }
 0x3bb   : > { %v1641_v44 = vadd.f32 %v1640_v42, %v1544_v11  ;;  %v1714_v24 = vadd.f32 %v1713_v43, %v1544_v11  ;;  %v1745_v45 = vmax.f32 %v1637_v36, 0.0  ;;  %v1747_v46 = vmax.f32 %v1710_v37, 0.0  ;;  %v1559_v10 = vpop.permute.xlu0 %1558  ;;  %v1564_v16 = vpop.permute.xlu1 %1563 }
 0x3bc   : > { %v1748_v22 = vmax.f32 %v1639_v40, 0.0  ;;  %v1750_v23 = vmax.f32 %v1712_v41, 0.0 }
 0x3bd   : > { %v1749_v53 = vmax.f32 %v1641_v44, 0.0  ;;  %v1751_v54 = vmax.f32 %v1714_v24, 0.0 }
 0x3be   : > { %v1776_v60 = vpack.c.bf16 %v1748_v22, %v1744_v20  ;;  %v1778_v63 = vpack.c.bf16 %v1750_v23, %v1746_v21 }
 0x3bf   : > { %v1777_v12 = vpack.c.bf16 %v1749_v53, %v1745_v45  ;;  %v1779_v0 = vpack.c.bf16 %v1751_v54, %v1747_v46  ;;  %v1644_v13 = vpop.f32.mrb[56].mxu0  ;;  %v1717_v2 = vpop.f32.mrb[56].mxu1 }
 0x3c0   : > { %v1645_v14 = vadd.f32 %v1644_v13, %v1549_v55  ;;  %v1718_v3 = vadd.f32 %v1717_v2, %v1549_v55  ;;  %v1646_v15 = vpop.f32.mrb[57].mxu0  ;;  %v1719_v30 = vpop.f32.mrb[57].mxu1 }
 0x3c1   : > { %v1647_v32 = vadd.f32 %v1646_v15, %v1549_v55  ;;  %v1720_v61 = vadd.f32 %v1719_v30, %v1549_v55  ;;  %v1648_v29 = vpop.f32.mrb[58].mxu0  ;;  %v1721_v31 = vpop.f32.mrb[58].mxu1  ;;  %1830 = vmatprep.subr.bf16.mxu0 %v1777_v12  ;;  %1883 = vmatprep.subr.bf16.mxu1 %v1779_v0  ;;  %v2281_v12 = vld [vmem:[%s2849_s9 + $0x8] sm:$0xff]  }
 0x3c2   : > { %v1649_v58 = vadd.f32 %v1648_v29, %v1554_v57  ;;  %v1722_v49 = vadd.f32 %v1721_v31, %v1554_v57  ;;  %v1650_v50 = vpop.f32.mrb[59].mxu0  ;;  %v1723_v51 = vpop.f32.mrb[59].mxu1  ;;  %1831 = vmatpush1.bf16.msra.mxu0 %v1776_v60  ;;  %1884 = vmatpush1.bf16.msra.mxu1 %v1778_v63  ;;  %v1752_v62 = vmax.f32 %v1645_v14, 0.0  ;;  %v1754_v1 = vmax.f32 %v1718_v3, 0.0  ;;  %v2280_v63 = vld [vmem:[%s2849_s9] sm:$0xff]  }
 0x3c3   : > { %v1651_v52 = vadd.f32 %v1650_v50, %v1554_v57  ;;  %v1724_v59 = vadd.f32 %v1723_v51, %v1554_v57  ;;  %v1753_v7 = vmax.f32 %v1647_v32, 0.0  ;;  %v1755_v8 = vmax.f32 %v1720_v61, 0.0  ;;  %v1795_v0 = vpop.permute.xlu0 %1794  ;;  %v1800_v13 = vpop.permute.xlu1 %1799 }
 0x3c4   : > { %v1756_v56 = vmax.f32 %v1649_v58, 0.0  ;;  %v1758_v4 = vmax.f32 %v1722_v49, 0.0 }
 0x3c5   : > { %v1757_v9 = vmax.f32 %v1651_v52, 0.0  ;;  %v1759_v6 = vmax.f32 %v1724_v59, 0.0 }
 0x3c6   : > { %v1780_v11 = vpack.c.bf16 %v1756_v56, %v1752_v62  ;;  %v1782_v17 = vpack.c.bf16 %v1758_v4, %v1754_v1 }
 0x3c7   : > { %v1781_v25 = vpack.c.bf16 %v1757_v9, %v1753_v7  ;;  %v1783_v18 = vpack.c.bf16 %v1759_v6, %v1755_v8  ;;  %v1654_v26 = vpop.f32.mrb[60].mxu0  ;;  %v1727_v19 = vpop.f32.mrb[60].mxu1 }
 0x3c8   : > { %v1655_v27 = vadd.f32 %v1654_v26, %v1559_v10  ;;  %v1728_v28 = vadd.f32 %v1727_v19, %v1559_v10  ;;  %v1656_v33 = vpop.f32.mrb[61].mxu0  ;;  %v1729_v34 = vpop.f32.mrb[61].mxu1 }
 0x3c9   : > { %v1657_v35 = vadd.f32 %v1656_v33, %v1559_v10  ;;  %v1730_v36 = vadd.f32 %v1729_v34, %v1559_v10  ;;  %v1658_v37 = vpop.f32.mrb[62].mxu0  ;;  %v1731_v38 = vpop.f32.mrb[62].mxu1  ;;  %1832 = vmatprep.subr.bf16.mxu0 %v1781_v25  ;;  %1885 = vmatprep.subr.bf16.mxu1 %v1783_v18 }
 0x3ca   : > { %v1659_v39 = vadd.f32 %v1658_v37, %v1564_v16  ;;  %v1732_v40 = vadd.f32 %v1731_v38, %v1564_v16  ;;  %v1660_v41 = vpop.f32.mrb[63].mxu0  ;;  %v1733_v42 = vpop.f32.mrb[63].mxu1  ;;  %1833 = vmatpush1.bf16.msra.mxu0 %v1780_v11  ;;  %1886 = vmatpush1.bf16.msra.mxu1 %v1782_v17  ;;  %v1760_v24 = vmax.f32 %v1655_v27, 0.0  ;;  %v1762_v20 = vmax.f32 %v1728_v28, 0.0 }
 0x3cb   : > { %v1661_v43 = vadd.f32 %v1660_v41, %v1564_v16  ;;  %v1734_v44 = vadd.f32 %v1733_v42, %v1564_v16  ;;  %v1761_v23 = vmax.f32 %v1657_v35, 0.0  ;;  %v1763_v45 = vmax.f32 %v1730_v36, 0.0  ;;  %v1805_v10 = vpop.permute.xlu0 %1804  ;;  %v1810_v16 = vpop.permute.xlu1 %1809 }
 0x3cc   : > { %v1764_v21 = vmax.f32 %v1659_v39, 0.0  ;;  %v1766_v22 = vmax.f32 %v1732_v40, 0.0 }
 0x3cd   : > { %v1765_v46 = vmax.f32 %v1661_v43, 0.0  ;;  %v1767_v53 = vmax.f32 %v1734_v44, 0.0 }
 0x3ce   : > { %v1784_v54 = vpack.c.bf16 %v1764_v21, %v1760_v24  ;;  %v1786_v55 = vpack.c.bf16 %v1766_v22, %v1762_v20 }
 0x3cf   : > { %v1785_v57 = vpack.c.bf16 %v1765_v46, %v1761_v23  ;;  %v1787_v60 = vpack.c.bf16 %v1767_v53, %v1763_v45 }
 0x3d1   : > { %1834 = vmatprep.subr.bf16.mxu0 %v1785_v57  ;;  %1887 = vmatprep.subr.bf16.mxu1 %v1787_v60 }
 0x3d2   : > { %1835 = vmatpush1.bf16.msra.mxu0 %v1784_v54  ;;  %1888 = vmatpush1.bf16.msra.mxu1 %v1786_v55 }
 0x3d5   : > { %2201 = vmatmul.mubr.msk.bf16.vlgmr.msra.gmra.mrb[64].mxu0 %vm1163_vm1, %v2280_v63  ;;  %2203 = vmatmul.mubr.msk.bf16.vlgmr.msra.gmra.mrb[64].mxu1 %vm1163_vm1, %v2280_v63  ;;  %v1950_v63 = vld [vmem:[%s2851_s11] sm:$0x1] }
 0x3d6   : > { %1870 = vmatprep.mubr.bf16.mxu0 %v2348_v5  ;;  %1923 = vmatprep.mubr.bf16.mxu1 %v2348_v5 }
 0x3dd   : > { %2202 = vmatmul.mubr.msk.bf16.gmra.mrb[68].mxu0 %vm1163_vm1, %v2281_v12  ;;  %2204 = vmatmul.mubr.msk.bf16.gmra.mrb[68].mxu1 %vm1163_vm1, %v2281_v12  ;;  %v2349_v12 = vmov 1966171168  }
 0x3de   : > { %1994 = vmatprep.mubr.bf16.mxu0 %v2348_v5  ;;  %2035 = vmatprep.mubr.bf16.mxu1 %v2348_v5 }
 0x4a8   : > { %v1862_v2 = vpop.f32.mrb[64].mxu0  ;;  %v1915_v14 = vpop.f32.mrb[64].mxu1 }
 0x4a9   : > { %v1863_v3 = vadd.f32 %v1862_v2, %v1795_v0  ;;  %v1916_v15 = vadd.f32 %v1915_v14, %v1795_v0  ;;  %v1864_v30 = vpop.f32.mrb[65].mxu0  ;;  %v1917_v32 = vpop.f32.mrb[65].mxu1 }
 0x4aa   : > { %v1865_v61 = vadd.f32 %v1864_v30, %v1795_v0  ;;  %v1918_v29 = vadd.f32 %v1917_v32, %v1795_v0  ;;  %v1866_v31 = vpop.f32.mrb[66].mxu0  ;;  %v1919_v58 = vpop.f32.mrb[66].mxu1  ;;  %v2051_v0 = vunpack.c.l.s4 %v2349_v12 }
 0x4ab   : > { %v1867_v49 = vadd.f32 %v1866_v31, %v1800_v13  ;;  %v1920_v50 = vadd.f32 %v1919_v58, %v1800_v13  ;;  %v1868_v51 = vpop.f32.mrb[67].mxu0  ;;  %v1921_v52 = vpop.f32.mrb[67].mxu1  ;;  %v1934_v1 = vmax.f32 %v1863_v3, 0.0  ;;  %v1936_v5 = vmax.f32 %v1916_v15, 0.0 }
 0x4ac   : > { %v1869_v59 = vadd.f32 %v1868_v51, %v1800_v13  ;;  %v1922_v62 = vadd.f32 %v1921_v52, %v1800_v13  ;;  %v1935_v7 = vmax.f32 %v1865_v61, 0.0  ;;  %v1937_v8 = vmax.f32 %v1918_v29, 0.0 }
 0x4ad   : > { %v1938_v56 = vmax.f32 %v1867_v49, 0.0  ;;  %v1940_v4 = vmax.f32 %v1920_v50, 0.0  ;;  %v2052_v13 = vunpack.c.0.s8 %v2051_v0 }
 0x4ae   : > { %v1939_v9 = vmax.f32 %v1869_v59, 0.0  ;;  %v1941_v6 = vmax.f32 %v1922_v62, 0.0 }
 0x4af   : > { %v1951_v11 = vpack.c.bf16 %v1938_v56, %v1934_v1  ;;  %v1953_v17 = vpack.c.bf16 %v1940_v4, %v1936_v5  ;;  %v2055_v3 = vsub.s32 %v2052_v13, %v2603_v48 }
 0x4b0   : > { %v1952_v25 = vpack.c.bf16 %v1939_v9, %v1935_v7  ;;  %v1954_v18 = vpack.c.bf16 %v1941_v6, %v1937_v8  ;;  %v1872_v26 = vpop.f32.mrb[68].mxu0  ;;  %v1925_v19 = vpop.f32.mrb[68].mxu1 }
 0x4b1   : > { %v1873_v27 = vadd.f32 %v1872_v26, %v1805_v10  ;;  %v1926_v28 = vadd.f32 %v1925_v19, %v1805_v10  ;;  %v1874_v33 = vpop.f32.mrb[69].mxu0  ;;  %v1927_v34 = vpop.f32.mrb[69].mxu1 }
 0x4b2   : > { %v1875_v35 = vadd.f32 %v1874_v33, %v1805_v10  ;;  %v1928_v36 = vadd.f32 %v1927_v34, %v1805_v10  ;;  %v1876_v37 = vpop.f32.mrb[70].mxu0  ;;  %v1929_v38 = vpop.f32.mrb[70].mxu1  ;;  %1962 = vmatprep.subr.bf16.mxu0 %v1952_v25  ;;  %2003 = vmatprep.subr.bf16.mxu1 %v1954_v18 }
 0x4b3   : > { %v1877_v39 = vadd.f32 %v1876_v37, %v1810_v16  ;;  %v1930_v40 = vadd.f32 %v1929_v38, %v1810_v16  ;;  %v1878_v41 = vpop.f32.mrb[71].mxu0  ;;  %v1931_v42 = vpop.f32.mrb[71].mxu1  ;;  %1963 = vmatpush1.bf16.msra.mxu0 %v1951_v11  ;;  %2004 = vmatpush1.bf16.msra.mxu1 %v1953_v17  ;;  %v1942_v24 = vmax.f32 %v1873_v27, 0.0  ;;  %v1944_v20 = vmax.f32 %v1926_v28, 0.0 }
 0x4b4   : > { %v1879_v43 = vadd.f32 %v1878_v41, %v1810_v16  ;;  %v1932_v44 = vadd.f32 %v1931_v42, %v1810_v16  ;;  %v1943_v23 = vmax.f32 %v1875_v35, 0.0  ;;  %v1945_v45 = vmax.f32 %v1928_v36, 0.0 }
 0x4b5   : > { %v1946_v21 = vmax.f32 %v1877_v39, 0.0  ;;  %v1948_v22 = vmax.f32 %v1930_v40, 0.0 }
 0x4b6   : > { %v1947_v46 = vmax.f32 %v1879_v43, 0.0  ;;  %v1949_v53 = vmax.f32 %v1932_v44, 0.0 }
 0x4b7   : > { %v1955_v54 = vpack.c.bf16 %v1946_v21, %v1942_v24  ;;  %v1957_v55 = vpack.c.bf16 %v1948_v22, %v1944_v20 }
 0x4b8   : > { %v1956_v57 = vpack.c.bf16 %v1947_v46, %v1943_v23  ;;  %v1958_v60 = vpack.c.bf16 %v1949_v53, %v1945_v45 }
 0x4ba   : > { %1964 = vmatprep.subr.bf16.mxu0 %v1956_v57  ;;  %2005 = vmatprep.subr.bf16.mxu1 %v1958_v60 }
 0x4bb   : > { %1965 = vmatpush1.bf16.msra.mxu0 %v1955_v54  ;;  %2006 = vmatpush1.bf16.msra.mxu1 %v1957_v55 }
 0x4be   : > { %2205 = vmatmul.mubr.msk.bf16.vlgmr.msra.gmra.mrb[72].mxu0 %vm804_vm0, %v1950_v63  ;;  %2206 = vmatmul.mubr.msk.bf16.vlgmr.msra.gmra.mrb[72].mxu1 %vm804_vm0, %v1950_v63 }
 0x591   : > { %v1996_v2 = vpop.f32.mrb[72].mxu0  ;;  %v2037_v14 = vpop.f32.mrb[72].mxu1 }
 0x592   : > { %v1998_v15 = vpop.f32.mrb[73].mxu0  ;;  %v2039_v30 = vpop.f32.mrb[73].mxu1 }
 0x593   : > { %v2048_v32 = vcombine.low %v1996_v2, %v1998_v15  ;;  %v2049_v61 = vcombine.low %v2037_v14, %v2039_v30  ;;  %v2000_v29 = vpop.f32.mrb[74].mxu0  ;;  %v2041_v31 = vpop.f32.mrb[74].mxu1 }
 0x594   : > { %v2001_v58 = vpop.f32.mrb[75].mxu0  ;;  %v2042_v49 = vpop.f32.mrb[75].mxu1 }
 0x595   : > { %v2056_v50 = vrot.slane %v2048_v32, %v2055_v3  ;;  %v2063_v51 = vrot.slane %v2049_v61, %v2055_v3 }
 0x597   : > { %v2064_v52 = vcombine.low %v2056_v50, %v2063_v51 }
 0x599   : > { %v2071_v59 = vrot.slane %v2064_v52, %v2055_v3 }
 0x59b   : > { %2077 = vst.msk [vmem:[%s407_s26] sm:$0xf] %vm2075_vm2, %v2071_v59 }
 0x59c   : > { %2295 = shalt.err (!%p2292_p3)
}
 0x59d   : > { %s2296_s18 = scalar_lea.hbm %s2798_s15, 64  ;;  %s2300_s1 = scalar_lea.hbm %s2852_s12, 256 }
 0x59e   : > { %p2297_p4 = scmp.ne.s32.totalorder %s2798_s15, %s2296_s18  ;;  %p2301_p9 = scmp.lt.u32.totalorder %s2798_s15, %s2852_s12 }
 0x59f   : > { %p2302_p10 = scmp.lt.u32.totalorder %s2300_s1, %s2296_s18  ;;  %p2304_p12 = scmp.lt.u32.totalorder %s2296_s18, %s2798_s15 }
 0x5a0   : > { %p2298_p7 = pnand %p2297_p4, %p2454_p5 }
 0x5a1   : > { %p2303_p11 = por %p2302_p10, %p2301_p9 }
 0x5a2   : > { %p2299_p8 = pneg %p2298_p7 }
 0x5a3   : > { %p2305_p13 = por %p2304_p12, %p2303_p11 }
 0x5a5   : > { %p2306_p0 = pnand %p2305_p13, %p2299_p8 }
 0x5a7   : > { %2309 = shalt.err (!%p2306_p0)
}
 0x5a8   : > { %2213 = dma.vmem_to_hbm [thread:$0]  (%p2454_p5), %s2800_s28, 64, %s2798_s15, %s2079_s16  }
 0x5a9 PF: > { %p2219_p1 = scmp.ge.s32.totalorder %s2344_s24, 2  ;;  %s2105_s0 = sand.u32 1, %s2332_s21  }
 0x5aa   : > { %s2106_s17 = scalar_lea.sflag [#allocation3], %s2105_s0 }
 0x5ab   : > { %p2216_p2 = pnand %p2219_p1, %p2458_p6 }
 0x5ad   : > { %2327 = dma.done.wait (!%p2216_p2), %s2106_s17, 64  }
 0x5ae   : > { %2329 = vsyncadd (!%p2216_p2), %s2106_s17, 4294967232  ;;  %p22_p3 = scmp.ge.s32.totalorder %s2441_s27, 6   ;;  %s2859_s21 = smov %s2336_s22 }
 0x5af   : > { %s2860_s22 = smov %s2340_s23  ;;  %s2861_s23 = smov %s2452_s30 }
 0x5b0   : > { %s2862_s24 = smov %s2441_s27  ;;  %24 = sbr.rel (!%p22_p3) target bundleno = 6 (0x6), region = 103 }
 0x5b7   :  { %2111 = vsyncpa [#allocation3], 1 }
 0x5b8   :  { %2113 = vsyncpa [#allocation3 + $0x1], 1 }

</bundles_post_ra>
